<compile_context>
chip_gen: v7x
topology: tpu7x:2x2x1
jax: 0.10.0
libtpu: 0.0.40
codegen_flags: <defaults>
</compile_context>

<pallas_src>
import numpy as np
import jax
import jax.numpy as jnp
from jax.experimental import pallas as pl
from jax.experimental.pallas import tpu as pltpu

INPUT_DIM = 64
HIDDEN = 32
# decode() in the reference requires latent_dims[-1] == hidden_dims[0]
LATENT_DIMS = (8, 16, 32)
NUM_LEVELS = len(LATENT_DIMS)
BN_EPS = 1e-5
LANES = 128
NUM_OUT = 1 + 2 * NUM_LEVELS + (NUM_LEVELS - 1)   # recon, z_i, stats_i, prior_i


# ------------------------------ parameters ----------------------------------

def init_params(key):
    """PyTorch-style init: Linear ~ U(-1/sqrt(fan_in), ..), BN gamma=1 beta=0.
    Weights are stored pre-transposed as (in, out); biases as (1, out)."""

    def linear(k, fan_in, fan_out):
        kw, kb = jax.random.split(k)
        lim = 1.0 / np.sqrt(fan_in)
        w = jax.random.uniform(kw, (fan_in, fan_out), jnp.float32, -lim, lim)
        b = jax.random.uniform(kb, (1, fan_out), jnp.float32, -lim, lim)
        return w, b

    def bn(fan):
        return jnp.ones((1, fan), jnp.float32), jnp.zeros((1, fan), jnp.float32)

    keys = iter(jax.random.split(key, 64))
    P = {}
    P['in_w'], P['in_b'] = linear(next(keys), INPUT_DIM, HIDDEN)
    P['in_g'], P['in_be'] = bn(HIDDEN)

    blocks = []
    for ld in LATENT_DIMS:
        blk = {}
        blk['bu_w1'], blk['bu_b1'] = linear(next(keys), HIDDEN, HIDDEN)
        blk['bu_g1'], blk['bu_be1'] = bn(HIDDEN)
        blk['bu_w2'], blk['bu_b2'] = linear(next(keys), HIDDEN, HIDDEN)
        blk['bu_g2'], blk['bu_be2'] = bn(HIDDEN)

        blk['td_w1'], blk['td_b1'] = linear(next(keys), HIDDEN + ld, HIDDEN)
        blk['td_g1'], blk['td_be1'] = bn(HIDDEN)
        blk['td_w2'], blk['td_b2'] = linear(next(keys), HIDDEN, HIDDEN)
        blk['td_g2'], blk['td_be2'] = bn(HIDDEN)

        blk['inf_w1'], blk['inf_b1'] = linear(next(keys), 2 * HIDDEN, HIDDEN)
        blk['inf_w2'], blk['inf_b2'] = linear(next(keys), HIDDEN, HIDDEN)
        # fused [mu | logvar] head
        mw, mb = linear(next(keys), HIDDEN, ld)
        lw, lb = linear(next(keys), HIDDEN, ld)
        blk['infstat_w'] = jnp.concatenate([mw, lw], axis=1)
        blk['infstat_b'] = jnp.concatenate([mb, lb], axis=1)

        blk['pri_w1'], blk['pri_b1'] = linear(next(keys), HIDDEN, HIDDEN)
        blk['pri_w2'], blk['pri_b2'] = linear(next(keys), HIDDEN, HIDDEN)
        pw, pb = linear(next(keys), HIDDEN, ld)
        qw, qb = linear(next(keys), HIDDEN, ld)
        blk['pristat_w'] = jnp.concatenate([pw, qw], axis=1)
        blk['pristat_b'] = jnp.concatenate([pb, qb], axis=1)
        blocks.append(blk)
    P['blocks'] = blocks

    P['out_w1'], P['out_b1'] = linear(next(keys), HIDDEN, HIDDEN)
    P['out_w2'], P['out_b2'] = linear(next(keys), HIDDEN, INPUT_DIM)
    return P


def pack_params(P):
    """Pack every parameter used by forward() into ONE lane-dense f32 slab of
    shape (rows, 128).  Weight matrices keep their (fan_in, fan_out) layout at
    an 8-aligned row offset (cols 0:fan_out, zero-padded); each 1-D vector gets
    its own 8-row group (data in row 0).  Linear biases that feed a
    training-mode BatchNorm are dropped (batch-mean subtraction cancels them)."""
    chunks = []
    entries = {}          # name -> (row_offset, n_rows == fan_in, width == fan_out)
    cur = 0

    def add_mat(name, w):
        nonlocal cur
        fin, fout = w.shape
        assert fin % 8 == 0 and fout <= LANES
        chunks.append(jnp.pad(w.astype(jnp.float32), ((0, 0), (0, LANES - fout))))
        entries[name] = (cur, fin, fout)
        cur += fin

    def add_vec(name, v):
        nonlocal cur
        v = jnp.reshape(v.astype(jnp.float32), (1, -1))
        w = v.shape[1]
        chunks.append(jnp.pad(v, ((0, 7), (0, LANES - w))))
        entries[name] = (cur, 1, w)
        cur += 8

    blocks = P['blocks']

    add_mat('in_w', P['in_w'])                                       # in_b dropped (BN)
    add_vec('in_g', P['in_g']); add_vec('in_be', P['in_be'])

    # bottom-up path batched across all levels along the lane axis (bu biases dropped: BN)
    add_mat('bu_w1', jnp.concatenate([b['bu_w1'] for b in blocks], axis=1))   # (32, 96)
    add_vec('bu_g1', jnp.concatenate([b['bu_g1'] for b in blocks], axis=1))
    add_vec('bu_be1', jnp.concatenate([b['bu_be1'] for b in blocks], axis=1))
    bd = jnp.zeros((NUM_LEVELS * HIDDEN, NUM_LEVELS * HIDDEN), jnp.float32)
    for i, b in enumerate(blocks):
        bd = bd.at[i * HIDDEN:(i + 1) * HIDDEN, i * HIDDEN:(i + 1) * HIDDEN].set(b['bu_w2'])
    add_mat('bu_w2', bd)                                                      # (96, 96) block-diag
    add_vec('bu_g2', jnp.concatenate([b['bu_g2'] for b in blocks], axis=1))
    add_vec('bu_be2', jnp.concatenate([b['bu_be2'] for b in blocks], axis=1))

    for i, b in enumerate(blocks):
        add_mat(f'td_w1_{i}', b['td_w1'])                            # td biases dropped (BN)
        add_vec(f'td_g1_{i}', b['td_g1']); add_vec(f'td_be1_{i}', b['td_be1'])
        add_mat(f'td_w2_{i}', b['td_w2'])
        add_vec(f'td_g2_{i}', b['td_g2']); add_vec(f'td_be2_{i}', b['td_be2'])
        add_mat(f'inf_w1_{i}', b['inf_w1']); add_vec(f'inf_b1_{i}', b['inf_b1'])
        add_mat(f'inf_w2_{i}', b['inf_w2']); add_vec(f'inf_b2_{i}', b['inf_b2'])
        add_mat(f'infstat_w_{i}', b['infstat_w']); add_vec(f'infstat_b_{i}', b['infstat_b'])
        if i < NUM_LEVELS - 1:   # top-level prior net is never evaluated in forward()
            add_mat(f'pri_w1_{i}', b['pri_w1']); add_vec(f'pri_b1_{i}', b['pri_b1'])
            add_mat(f'pri_w2_{i}', b['pri_w2']); add_vec(f'pri_b2_{i}', b['pri_b2'])
            add_mat(f'pristat_w_{i}', b['pristat_w']); add_vec(f'pristat_b_{i}', b['pristat_b'])

    add_mat('out_w1', P['out_w1']); add_vec('out_b1', P['out_b1'])
    add_mat('out_w2', P['out_w2']); add_vec('out_b2', P['out_b2'])

    slab = jnp.concatenate(chunks, axis=0)
    assert slab.shape == (cur, LANES) and cur % 8 == 0
    return slab, entries


# ------------------------------- kernel --------------------------------------

def _make_kernel(entries):
    def kernel(xe_ref, p_ref, out_ref):
        # ---- static, 8-aligned views into the packed parameter slab ----
        def mat(name, row0=0, nrows=None):
            r, fin, fout = entries[name]
            nrows = fin - row0 if nrows is None else nrows
            return p_ref[r + row0:r + row0 + nrows, :][:, :fout]

        def vec(name):
            r, _, w = entries[name]
            return p_ref[r:r + 1, :][:, :w]

        def lin(h, wname, bname=None):
            y = jnp.dot(h, mat(wname), preferred_element_type=jnp.float32)
            return y if bname is None else y + vec(bname)

        def lin_cat(a, b, wname, bname=None):
            # cat([a, b], axis=1) @ W  ==  a @ W[:sa] + b @ W[sa:]
            sa = a.shape[1]
            y = (jnp.dot(a, mat(wname, 0, sa), preferred_element_type=jnp.float32)
                 + jnp.dot(b, mat(wname, sa), preferred_element_type=jnp.float32))
            return y if bname is None else y + vec(bname)

        def bnorm(h, gname, bename):
            # BatchNorm1d, training mode: per-batch mean / biased variance.
            m = jnp.mean(h, axis=0, keepdims=True)
            c = h - m
            v = jnp.mean(c * c, axis=0, keepdims=True)
            return c * jax.lax.rsqrt(v + BN_EPS) * vec(gname) + vec(bename)

        relu = lambda t: jnp.maximum(t, 0.0)

        def td_net(i, a, b):
            h = relu(bnorm(lin_cat(a, b, f'td_w1_{i}'), f'td_g1_{i}', f'td_be1_{i}'))
            return relu(bnorm(lin(h, f'td_w2_{i}'), f'td_g2_{i}', f'td_be2_{i}'))

        # ---- single packed input block: x | eps_0 | eps_1 | eps_2 ----
        xe = xe_ref[...]
        x = xe[:, :INPUT_DIM]
        eps, off = [], INPUT_DIM
        for ld in LATENT_DIMS:
            eps.append(xe[:, off:off + ld])
            off += ld

        # input layer: Linear -> BN -> ReLU (shared bottom-up input for all levels)
        feat = relu(bnorm(lin(x, 'in_w'), 'in_g', 'in_be'))

        # bottom-up path batched across all levels (depends only on feat)
        bu_all = relu(bnorm(lin(feat, 'bu_w1'), 'bu_g1', 'bu_be1'))     # (B, 96)
        bu_all = relu(bnorm(lin(bu_all, 'bu_w2'), 'bu_g2', 'bu_be2'))   # (B, 96)
        bu = [bu_all[:, i * HIDDEN:(i + 1) * HIDDEN] for i in range(NUM_LEVELS)]

        # ------------------------------ encode -------------------------------
        z = [None] * NUM_LEVELS
        stats = [None] * NUM_LEVELS
        prior = [None] * (NUM_LEVELS - 1)
        td = None
        for i in reversed(range(NUM_LEVELS)):     # top level first
            ld = LATENT_DIMS[i]
            ctx = bu[i] if td is None else td     # cat-partner / td_input head

            h = relu(lin_cat(bu[i], ctx, f'inf_w1_{i}', f'inf_b1_{i}'))
            h = relu(lin(h, f'inf_w2_{i}', f'inf_b2_{i}'))
            st = lin(h, f'infstat_w_{i}', f'infstat_b_{i}')             # (B, 2*ld) = [mu|logvar]
            mu, logvar = st[:, :ld], st[:, ld:]

            if td is not None:                    # top-level prior is N(0, I)
                ph = relu(lin(td, f'pri_w1_{i}', f'pri_b1_{i}'))
                ph = relu(lin(ph, f'pri_w2_{i}', f'pri_b2_{i}'))
                prior[i] = lin(ph, f'pristat_w_{i}', f'pristat_b_{i}')  # (B, 2*ld)

            z[i] = mu + eps[i] * jnp.exp(0.5 * logvar)                  # reparameterization
            stats[i] = st
            td = td_net(i, ctx, z[i])             # top-down features for level below

        # ------------------------------ decode -------------------------------
        dtd = z[NUM_LEVELS - 1]                   # latent_dims[-1] == HIDDEN
        for i in reversed(range(NUM_LEVELS - 1)):
            dtd = td_net(i, dtd, z[i])
        h = relu(lin(dtd, 'out_w1', 'out_b1'))
        recon = jax.nn.sigmoid(lin(h, 'out_w2', 'out_b2'))

        # ----------------- single lane-dense output block --------------------
        out_ref[...] = jnp.zeros(out_ref.shape, out_ref.dtype)
        pieces = [recon] + z + stats + prior      # 1 + 3 + 3 + 2 = NUM_OUT
        for k, pc in enumerate(pieces):
            out_ref[k, :, :pc.shape[1]] = pc

    return kernel


# ------------------------------- forward --------------------------------------

def forward(slab, entries, x, eps_key):
    B = x.shape[0]
    x = x.astype(jnp.float32)
    # TODO(synk): torch.randn_like is replaced by deterministic jax.random noise.
    eps = [jax.random.normal(jax.random.fold_in(eps_key, i), (B, ld), jnp.float32)
           for i, ld in enumerate(LATENT_DIMS)]

    # pack x and all eps into ONE (B, 128) lane-dense input block
    used = INPUT_DIM + sum(LATENT_DIMS)
    xe = jnp.concatenate([x] + eps + [jnp.zeros((B, LANES - used), jnp.float32)], axis=1)

    flops = sum(2 * B * fin * fout for (_, fin, fout) in entries.values() if fin > 1)
    cost = pl.CostEstimate(
        flops=2 * flops,                                   # td nets are reused in decode
        transcendentals=8 * B * LANES,
        bytes_accessed=int(slab.size) * 4 + 4 * B * LANES * (1 + NUM_OUT))

    vspec = pl.BlockSpec(memory_space=pltpu.MemorySpace.VMEM)
    out = pl.pallas_call(
        _make_kernel(entries),
        out_shape=jax.ShapeDtypeStruct((NUM_OUT, B, LANES), jnp.float32),
        in_specs=[vspec, vspec],
        out_specs=vspec,
        cost_estimate=cost,
    )(xe, slab)
    # TODO(synk): for B >> 2 add a ("parallel",) batch grid axis so both v7x
    # TensorCores are used; at B=2 a single grid-less invocation is optimal.

    recon = out[0, :, :INPUT_DIM]
    z_samples = [out[1 + i, :, :LATENT_DIMS[i]] for i in range(NUM_LEVELS)]
    latent_params = []
    for i, ld in enumerate(LATENT_DIMS):
        st = out[1 + NUM_LEVELS + i, :, :2 * ld]
        mu, logvar = st[:, :ld], st[:, ld:]
        if i < NUM_LEVELS - 1:
            pst = out[1 + 2 * NUM_LEVELS + i, :, :2 * ld]
            pmu, plv = pst[:, :ld], pst[:, ld:]
        else:   # top-level prior is the standard normal (torch.zeros in the reference)
            pmu = jnp.zeros((B, ld), jnp.float32)
            plv = jnp.zeros((B, ld), jnp.float32)
        latent_params.append({'mu': mu, 'logvar': logvar,
                              'prior_mu': pmu, 'prior_logvar': plv,
                              'sample': z_samples[i]})

    return {'reconstruction': recon,
            'latent_params': latent_params,
            'z_samples': z_samples}


if __name__ == "__main__":
    key = jax.random.PRNGKey(0)
    pkey, xkey, ekey = jax.random.split(key, 3)
    params = init_params(pkey)
    slab, entries = pack_params(params)          # packed once, reused every call

    B = 2
    x = jax.random.uniform(xkey, (B, INPUT_DIM), jnp.float32)
    out = forward(slab, entries, x, ekey)
    jax.block_until_ready(out["reconstruction"])

    assert out["reconstruction"].shape == (B, INPUT_DIM)
    for i, ld in enumerate(LATENT_DIMS):
        assert out["z_samples"][i].shape == (B, ld)
        assert out["latent_params"][i]["mu"].shape == (B, ld)
        assert out["latent_params"][i]["logvar"].shape == (B, ld)
        assert out["latent_params"][i]["prior_mu"].shape == (B, ld)
        assert out["latent_params"][i]["prior_logvar"].shape == (B, ld)
        assert out["latent_params"][i]["sample"].shape == (B, ld)
    assert bool(jnp.all(jnp.isfinite(out["reconstruction"])))
    print("KERNEL_OK")
</pallas_src>

<mosaic_0001>
module attributes {stable_mosaic.version = 11 : i64} {
  func.func @kernel(%arg0: memref<2x128xf32, #tpu.memory_space<vmem>>, %arg1: memref<1360x128xf32, #tpu.memory_space<vmem>>, %arg2: memref<9x2x128xf32, #tpu.memory_space<vmem>>) attributes {dimension_semantics = [], scalar_prefetch = 0 : i64, scratch_operands = 0 : i64, tpu.core_type = #tpu.core_type<tc>} {
    %c0 = arith.constant 0 : index
    %c0_0 = arith.constant 0 : index
    %0 = vector.load %arg0[%c0, %c0_0] : memref<2x128xf32, #tpu.memory_space<vmem>>, vector<2x128xf32>
    %1 = vector.extract_strided_slice %0 {offsets = [0, 0], sizes = [2, 64], strides = [1, 1]} : vector<2x128xf32> to vector<2x64xf32>
    %2 = vector.extract_strided_slice %0 {offsets = [0, 64], sizes = [2, 8], strides = [1, 1]} : vector<2x128xf32> to vector<2x8xf32>
    %3 = vector.extract_strided_slice %0 {offsets = [0, 72], sizes = [2, 16], strides = [1, 1]} : vector<2x128xf32> to vector<2x16xf32>
    %4 = vector.extract_strided_slice %0 {offsets = [0, 88], sizes = [2, 32], strides = [1, 1]} : vector<2x128xf32> to vector<2x32xf32>
    %c0_1 = arith.constant 0 : index
    %c0_2 = arith.constant 0 : index
    %5 = vector.load %arg1[%c0_1, %c0_2] : memref<1360x128xf32, #tpu.memory_space<vmem>>, vector<64x128xf32>
    %6 = vector.extract_strided_slice %5 {offsets = [0, 0], sizes = [64, 32], strides = [1, 1]} : vector<64x128xf32> to vector<64x32xf32>
    %cst = arith.constant dense<0.000000e+00> : vector<2x32xf32>
    %7 = tpu.matmul %1, %6, %cst {dimension_numbers = #tpu.dot_dimension_numbers<[1], [0], [0], [1], [0, 0, 1, 1], [], []>} : vector<2x64xf32>, vector<64x32xf32>, vector<2x32xf32> -> vector<2x32xf32>
    %cst_3 = arith.constant dense<0.000000e+00> : vector<32xf32>
    %8 = vector.multi_reduction <add>, %7, %cst_3 [0] : vector<2x32xf32> to vector<32xf32>
    %9 = vector.shape_cast %8 : vector<32xf32> to vector<1x32xf32>
    %cst_4 = arith.constant 2.000000e+00 : f32
    %10 = vector.broadcast %cst_4 : f32 to vector<1x32xf32>
    %11 = arith.divf %9, %10 : vector<1x32xf32>
    %12 = vector.broadcast %11 : vector<1x32xf32> to vector<2x32xf32>
    %13 = arith.subf %7, %12 : vector<2x32xf32>
    %14 = arith.mulf %13, %13 : vector<2x32xf32>
    %cst_5 = arith.constant dense<0.000000e+00> : vector<32xf32>
    %15 = vector.multi_reduction <add>, %14, %cst_5 [0] : vector<2x32xf32> to vector<32xf32>
    %16 = vector.shape_cast %15 : vector<32xf32> to vector<1x32xf32>
    %cst_6 = arith.constant 2.000000e+00 : f32
    %17 = vector.broadcast %cst_6 : f32 to vector<1x32xf32>
    %18 = arith.divf %16, %17 : vector<1x32xf32>
    %cst_7 = arith.constant 9.99999974E-6 : f32
    %19 = vector.broadcast %cst_7 : f32 to vector<1x32xf32>
    %20 = arith.addf %18, %19 : vector<1x32xf32>
    %21 = math.rsqrt %20 : vector<1x32xf32>
    %22 = vector.broadcast %21 : vector<1x32xf32> to vector<2x32xf32>
    %23 = arith.mulf %13, %22 : vector<2x32xf32>
    %c64 = arith.constant 64 : index
    %c0_8 = arith.constant 0 : index
    %24 = vector.load %arg1[%c64, %c0_8] : memref<1360x128xf32, #tpu.memory_space<vmem>>, vector<1x128xf32>
    %25 = vector.extract_strided_slice %24 {offsets = [0, 0], sizes = [1, 32], strides = [1, 1]} : vector<1x128xf32> to vector<1x32xf32>
    %26 = vector.broadcast %25 : vector<1x32xf32> to vector<2x32xf32>
    %27 = arith.mulf %23, %26 : vector<2x32xf32>
    %c72 = arith.constant 72 : index
    %c0_9 = arith.constant 0 : index
    %28 = vector.load %arg1[%c72, %c0_9] : memref<1360x128xf32, #tpu.memory_space<vmem>>, vector<1x128xf32>
    %29 = vector.extract_strided_slice %28 {offsets = [0, 0], sizes = [1, 32], strides = [1, 1]} : vector<1x128xf32> to vector<1x32xf32>
    %30 = vector.broadcast %29 : vector<1x32xf32> to vector<2x32xf32>
    %31 = arith.addf %27, %30 : vector<2x32xf32>
    %cst_10 = arith.constant 0.000000e+00 : f32
    %32 = vector.broadcast %cst_10 : f32 to vector<2x32xf32>
    %33 = arith.maximumf %31, %32 : vector<2x32xf32>
    %c80 = arith.constant 80 : index
    %c0_11 = arith.constant 0 : index
    %34 = vector.load %arg1[%c80, %c0_11] : memref<1360x128xf32, #tpu.memory_space<vmem>>, vector<32x128xf32>
    %35 = vector.extract_strided_slice %34 {offsets = [0, 0], sizes = [32, 96], strides = [1, 1]} : vector<32x128xf32> to vector<32x96xf32>
    %cst_12 = arith.constant dense<0.000000e+00> : vector<2x96xf32>
    %36 = tpu.matmul %33, %35, %cst_12 {dimension_numbers = #tpu.dot_dimension_numbers<[1], [0], [0], [1], [0, 0, 1, 1], [], []>} : vector<2x32xf32>, vector<32x96xf32>, vector<2x96xf32> -> vector<2x96xf32>
    %cst_13 = arith.constant dense<0.000000e+00> : vector<96xf32>
    %37 = vector.multi_reduction <add>, %36, %cst_13 [0] : vector<2x96xf32> to vector<96xf32>
    %38 = vector.shape_cast %37 : vector<96xf32> to vector<1x96xf32>
    %cst_14 = arith.constant 2.000000e+00 : f32
    %39 = vector.broadcast %cst_14 : f32 to vector<1x96xf32>
    %40 = arith.divf %38, %39 : vector<1x96xf32>
    %41 = vector.broadcast %40 : vector<1x96xf32> to vector<2x96xf32>
    %42 = arith.subf %36, %41 : vector<2x96xf32>
    %43 = arith.mulf %42, %42 : vector<2x96xf32>
    %cst_15 = arith.constant dense<0.000000e+00> : vector<96xf32>
    %44 = vector.multi_reduction <add>, %43, %cst_15 [0] : vector<2x96xf32> to vector<96xf32>
    %45 = vector.shape_cast %44 : vector<96xf32> to vector<1x96xf32>
    %cst_16 = arith.constant 2.000000e+00 : f32
    %46 = vector.broadcast %cst_16 : f32 to vector<1x96xf32>
    %47 = arith.divf %45, %46 : vector<1x96xf32>
    %cst_17 = arith.constant 9.99999974E-6 : f32
    %48 = vector.broadcast %cst_17 : f32 to vector<1x96xf32>
    %49 = arith.addf %47, %48 : vector<1x96xf32>
    %50 = math.rsqrt %49 : vector<1x96xf32>
    %51 = vector.broadcast %50 : vector<1x96xf32> to vector<2x96xf32>
    %52 = arith.mulf %42, %51 : vector<2x96xf32>
    %c112 = arith.constant 112 : index
    %c0_18 = arith.constant 0 : index
    %53 = vector.load %arg1[%c112, %c0_18] : memref<1360x128xf32, #tpu.memory_space<vmem>>, vector<1x128xf32>
    %54 = vector.extract_strided_slice %53 {offsets = [0, 0], sizes = [1, 96], strides = [1, 1]} : vector<1x128xf32> to vector<1x96xf32>
    %55 = vector.broadcast %54 : vector<1x96xf32> to vector<2x96xf32>
    %56 = arith.mulf %52, %55 : vector<2x96xf32>
    %c120 = arith.constant 120 : index
    %c0_19 = arith.constant 0 : index
    %57 = vector.load %arg1[%c120, %c0_19] : memref<1360x128xf32, #tpu.memory_space<vmem>>, vector<1x128xf32>
    %58 = vector.extract_strided_slice %57 {offsets = [0, 0], sizes = [1, 96], strides = [1, 1]} : vector<1x128xf32> to vector<1x96xf32>
    %59 = vector.broadcast %58 : vector<1x96xf32> to vector<2x96xf32>
    %60 = arith.addf %56, %59 : vector<2x96xf32>
    %cst_20 = arith.constant 0.000000e+00 : f32
    %61 = vector.broadcast %cst_20 : f32 to vector<2x96xf32>
    %62 = arith.maximumf %60, %61 : vector<2x96xf32>
    %c128 = arith.constant 128 : index
    %c0_21 = arith.constant 0 : index
    %63 = vector.load %arg1[%c128, %c0_21] : memref<1360x128xf32, #tpu.memory_space<vmem>>, vector<96x128xf32>
    %64 = vector.extract_strided_slice %63 {offsets = [0, 0], sizes = [96, 96], strides = [1, 1]} : vector<96x128xf32> to vector<96x96xf32>
    %cst_22 = arith.constant dense<0.000000e+00> : vector<2x96xf32>
    %65 = tpu.matmul %62, %64, %cst_22 {dimension_numbers = #tpu.dot_dimension_numbers<[1], [0], [0], [1], [0, 0, 1, 1], [], []>} : vector<2x96xf32>, vector<96x96xf32>, vector<2x96xf32> -> vector<2x96xf32>
    %cst_23 = arith.constant dense<0.000000e+00> : vector<96xf32>
    %66 = vector.multi_reduction <add>, %65, %cst_23 [0] : vector<2x96xf32> to vector<96xf32>
    %67 = vector.shape_cast %66 : vector<96xf32> to vector<1x96xf32>
    %cst_24 = arith.constant 2.000000e+00 : f32
    %68 = vector.broadcast %cst_24 : f32 to vector<1x96xf32>
    %69 = arith.divf %67, %68 : vector<1x96xf32>
    %70 = vector.broadcast %69 : vector<1x96xf32> to vector<2x96xf32>
    %71 = arith.subf %65, %70 : vector<2x96xf32>
    %72 = arith.mulf %71, %71 : vector<2x96xf32>
    %cst_25 = arith.constant dense<0.000000e+00> : vector<96xf32>
    %73 = vector.multi_reduction <add>, %72, %cst_25 [0] : vector<2x96xf32> to vector<96xf32>
    %74 = vector.shape_cast %73 : vector<96xf32> to vector<1x96xf32>
    %cst_26 = arith.constant 2.000000e+00 : f32
    %75 = vector.broadcast %cst_26 : f32 to vector<1x96xf32>
    %76 = arith.divf %74, %75 : vector<1x96xf32>
    %cst_27 = arith.constant 9.99999974E-6 : f32
    %77 = vector.broadcast %cst_27 : f32 to vector<1x96xf32>
    %78 = arith.addf %76, %77 : vector<1x96xf32>
    %79 = math.rsqrt %78 : vector<1x96xf32>
    %80 = vector.broadcast %79 : vector<1x96xf32> to vector<2x96xf32>
    %81 = arith.mulf %71, %80 : vector<2x96xf32>
    %c224 = arith.constant 224 : index
    %c0_28 = arith.constant 0 : index
    %82 = vector.load %arg1[%c224, %c0_28] : memref<1360x128xf32, #tpu.memory_space<vmem>>, vector<1x128xf32>
    %83 = vector.extract_strided_slice %82 {offsets = [0, 0], sizes = [1, 96], strides = [1, 1]} : vector<1x128xf32> to vector<1x96xf32>
    %84 = vector.broadcast %83 : vector<1x96xf32> to vector<2x96xf32>
    %85 = arith.mulf %81, %84 : vector<2x96xf32>
    %c232 = arith.constant 232 : index
    %c0_29 = arith.constant 0 : index
    %86 = vector.load %arg1[%c232, %c0_29] : memref<1360x128xf32, #tpu.memory_space<vmem>>, vector<1x128xf32>
    %87 = vector.extract_strided_slice %86 {offsets = [0, 0], sizes = [1, 96], strides = [1, 1]} : vector<1x128xf32> to vector<1x96xf32>
    %88 = vector.broadcast %87 : vector<1x96xf32> to vector<2x96xf32>
    %89 = arith.addf %85, %88 : vector<2x96xf32>
    %cst_30 = arith.constant 0.000000e+00 : f32
    %90 = vector.broadcast %cst_30 : f32 to vector<2x96xf32>
    %91 = arith.maximumf %89, %90 : vector<2x96xf32>
    %92 = vector.extract_strided_slice %91 {offsets = [0, 0], sizes = [2, 32], strides = [1, 1]} : vector<2x96xf32> to vector<2x32xf32>
    %93 = vector.extract_strided_slice %91 {offsets = [0, 32], sizes = [2, 32], strides = [1, 1]} : vector<2x96xf32> to vector<2x32xf32>
    %94 = vector.extract_strided_slice %91 {offsets = [0, 64], sizes = [2, 32], strides = [1, 1]} : vector<2x96xf32> to vector<2x32xf32>
    %c1128 = arith.constant 1128 : index
    %c0_31 = arith.constant 0 : index
    %95 = vector.load %arg1[%c1128, %c0_31] : memref<1360x128xf32, #tpu.memory_space<vmem>>, vector<32x128xf32>
    %96 = vector.extract_strided_slice %95 {offsets = [0, 0], sizes = [32, 32], strides = [1, 1]} : vector<32x128xf32> to vector<32x32xf32>
    %cst_32 = arith.constant dense<0.000000e+00> : vector<2x32xf32>
    %97 = tpu.matmul %94, %96, %cst_32 {dimension_numbers = #tpu.dot_dimension_numbers<[1], [0], [0], [1], [0, 0, 1, 1], [], []>} : vector<2x32xf32>, vector<32x32xf32>, vector<2x32xf32> -> vector<2x32xf32>
    %c1160 = arith.constant 1160 : index
    %c0_33 = arith.constant 0 : index
    %98 = vector.load %arg1[%c1160, %c0_33] : memref<1360x128xf32, #tpu.memory_space<vmem>>, vector<32x128xf32>
    %99 = vector.extract_strided_slice %98 {offsets = [0, 0], sizes = [32, 32], strides = [1, 1]} : vector<32x128xf32> to vector<32x32xf32>
    %cst_34 = arith.constant dense<0.000000e+00> : vector<2x32xf32>
    %100 = tpu.matmul %94, %99, %cst_34 {dimension_numbers = #tpu.dot_dimension_numbers<[1], [0], [0], [1], [0, 0, 1, 1], [], []>} : vector<2x32xf32>, vector<32x32xf32>, vector<2x32xf32> -> vector<2x32xf32>
    %101 = arith.addf %97, %100 : vector<2x32xf32>
    %c1192 = arith.constant 1192 : index
    %c0_35 = arith.constant 0 : index
    %102 = vector.load %arg1[%c1192, %c0_35] : memref<1360x128xf32, #tpu.memory_space<vmem>>, vector<1x128xf32>
    %103 = vector.extract_strided_slice %102 {offsets = [0, 0], sizes = [1, 32], strides = [1, 1]} : vector<1x128xf32> to vector<1x32xf32>
    %104 = vector.broadcast %103 : vector<1x32xf32> to vector<2x32xf32>
    %105 = arith.addf %101, %104 : vector<2x32xf32>
    %cst_36 = arith.constant 0.000000e+00 : f32
    %106 = vector.broadcast %cst_36 : f32 to vector<2x32xf32>
    %107 = arith.maximumf %105, %106 : vector<2x32xf32>
    %c1200 = arith.constant 1200 : index
    %c0_37 = arith.constant 0 : index
    %108 = vector.load %arg1[%c1200, %c0_37] : memref<1360x128xf32, #tpu.memory_space<vmem>>, vector<32x128xf32>
    %109 = vector.extract_strided_slice %108 {offsets = [0, 0], sizes = [32, 32], strides = [1, 1]} : vector<32x128xf32> to vector<32x32xf32>
    %cst_38 = arith.constant dense<0.000000e+00> : vector<2x32xf32>
    %110 = tpu.matmul %107, %109, %cst_38 {dimension_numbers = #tpu.dot_dimension_numbers<[1], [0], [0], [1], [0, 0, 1, 1], [], []>} : vector<2x32xf32>, vector<32x32xf32>, vector<2x32xf32> -> vector<2x32xf32>
    %c1232 = arith.constant 1232 : index
    %c0_39 = arith.constant 0 : index
    %111 = vector.load %arg1[%c1232, %c0_39] : memref<1360x128xf32, #tpu.memory_space<vmem>>, vector<1x128xf32>
    %112 = vector.extract_strided_slice %111 {offsets = [0, 0], sizes = [1, 32], strides = [1, 1]} : vector<1x128xf32> to vector<1x32xf32>
    %113 = vector.broadcast %112 : vector<1x32xf32> to vector<2x32xf32>
    %114 = arith.addf %110, %113 : vector<2x32xf32>
    %cst_40 = arith.constant 0.000000e+00 : f32
    %115 = vector.broadcast %cst_40 : f32 to vector<2x32xf32>
    %116 = arith.maximumf %114, %115 : vector<2x32xf32>
    %c1240 = arith.constant 1240 : index
    %c0_41 = arith.constant 0 : index
    %117 = vector.load %arg1[%c1240, %c0_41] : memref<1360x128xf32, #tpu.memory_space<vmem>>, vector<32x128xf32>
    %118 = vector.extract_strided_slice %117 {offsets = [0, 0], sizes = [32, 64], strides = [1, 1]} : vector<32x128xf32> to vector<32x64xf32>
    %cst_42 = arith.constant dense<0.000000e+00> : vector<2x64xf32>
    %119 = tpu.matmul %116, %118, %cst_42 {dimension_numbers = #tpu.dot_dimension_numbers<[1], [0], [0], [1], [0, 0, 1, 1], [], []>} : vector<2x32xf32>, vector<32x64xf32>, vector<2x64xf32> -> vector<2x64xf32>
    %c1272 = arith.constant 1272 : index
    %c0_43 = arith.constant 0 : index
    %120 = vector.load %arg1[%c1272, %c0_43] : memref<1360x128xf32, #tpu.memory_space<vmem>>, vector<1x128xf32>
    %121 = vector.extract_strided_slice %120 {offsets = [0, 0], sizes = [1, 64], strides = [1, 1]} : vector<1x128xf32> to vector<1x64xf32>
    %122 = vector.broadcast %121 : vector<1x64xf32> to vector<2x64xf32>
    %123 = arith.addf %119, %122 : vector<2x64xf32>
    %124 = vector.extract_strided_slice %123 {offsets = [0, 0], sizes = [2, 32], strides = [1, 1]} : vector<2x64xf32> to vector<2x32xf32>
    %125 = vector.extract_strided_slice %123 {offsets = [0, 32], sizes = [2, 32], strides = [1, 1]} : vector<2x64xf32> to vector<2x32xf32>
    %cst_44 = arith.constant 5.000000e-01 : f32
    %126 = vector.broadcast %cst_44 : f32 to vector<2x32xf32>
    %127 = arith.mulf %126, %125 : vector<2x32xf32>
    %128 = math.exp %127 : vector<2x32xf32>
    %129 = arith.mulf %4, %128 : vector<2x32xf32>
    %130 = arith.addf %124, %129 : vector<2x32xf32>
    %c1000 = arith.constant 1000 : index
    %c0_45 = arith.constant 0 : index
    %131 = vector.load %arg1[%c1000, %c0_45] : memref<1360x128xf32, #tpu.memory_space<vmem>>, vector<32x128xf32>
    %132 = vector.extract_strided_slice %131 {offsets = [0, 0], sizes = [32, 32], strides = [1, 1]} : vector<32x128xf32> to vector<32x32xf32>
    %cst_46 = arith.constant dense<0.000000e+00> : vector<2x32xf32>
    %133 = tpu.matmul %94, %132, %cst_46 {dimension_numbers = #tpu.dot_dimension_numbers<[1], [0], [0], [1], [0, 0, 1, 1], [], []>} : vector<2x32xf32>, vector<32x32xf32>, vector<2x32xf32> -> vector<2x32xf32>
    %c1032 = arith.constant 1032 : index
    %c0_47 = arith.constant 0 : index
    %134 = vector.load %arg1[%c1032, %c0_47] : memref<1360x128xf32, #tpu.memory_space<vmem>>, vector<32x128xf32>
    %135 = vector.extract_strided_slice %134 {offsets = [0, 0], sizes = [32, 32], strides = [1, 1]} : vector<32x128xf32> to vector<32x32xf32>
    %cst_48 = arith.constant dense<0.000000e+00> : vector<2x32xf32>
    %136 = tpu.matmul %130, %135, %cst_48 {dimension_numbers = #tpu.dot_dimension_numbers<[1], [0], [0], [1], [0, 0, 1, 1], [], []>} : vector<2x32xf32>, vector<32x32xf32>, vector<2x32xf32> -> vector<2x32xf32>
    %137 = arith.addf %133, %136 : vector<2x32xf32>
    %cst_49 = arith.constant dense<0.000000e+00> : vector<32xf32>
    %138 = vector.multi_reduction <add>, %137, %cst_49 [0] : vector<2x32xf32> to vector<32xf32>
    %139 = vector.shape_cast %138 : vector<32xf32> to vector<1x32xf32>
    %cst_50 = arith.constant 2.000000e+00 : f32
    %140 = vector.broadcast %cst_50 : f32 to vector<1x32xf32>
    %141 = arith.divf %139, %140 : vector<1x32xf32>
    %142 = vector.broadcast %141 : vector<1x32xf32> to vector<2x32xf32>
    %143 = arith.subf %137, %142 : vector<2x32xf32>
    %144 = arith.mulf %143, %143 : vector<2x32xf32>
    %cst_51 = arith.constant dense<0.000000e+00> : vector<32xf32>
    %145 = vector.multi_reduction <add>, %144, %cst_51 [0] : vector<2x32xf32> to vector<32xf32>
    %146 = vector.shape_cast %145 : vector<32xf32> to vector<1x32xf32>
    %cst_52 = arith.constant 2.000000e+00 : f32
    %147 = vector.broadcast %cst_52 : f32 to vector<1x32xf32>
    %148 = arith.divf %146, %147 : vector<1x32xf32>
    %cst_53 = arith.constant 9.99999974E-6 : f32
    %149 = vector.broadcast %cst_53 : f32 to vector<1x32xf32>
    %150 = arith.addf %148, %149 : vector<1x32xf32>
    %151 = math.rsqrt %150 : vector<1x32xf32>
    %152 = vector.broadcast %151 : vector<1x32xf32> to vector<2x32xf32>
    %153 = arith.mulf %143, %152 : vector<2x32xf32>
    %c1064 = arith.constant 1064 : index
    %c0_54 = arith.constant 0 : index
    %154 = vector.load %arg1[%c1064, %c0_54] : memref<1360x128xf32, #tpu.memory_space<vmem>>, vector<1x128xf32>
    %155 = vector.extract_strided_slice %154 {offsets = [0, 0], sizes = [1, 32], strides = [1, 1]} : vector<1x128xf32> to vector<1x32xf32>
    %156 = vector.broadcast %155 : vector<1x32xf32> to vector<2x32xf32>
    %157 = arith.mulf %153, %156 : vector<2x32xf32>
    %c1072 = arith.constant 1072 : index
    %c0_55 = arith.constant 0 : index
    %158 = vector.load %arg1[%c1072, %c0_55] : memref<1360x128xf32, #tpu.memory_space<vmem>>, vector<1x128xf32>
    %159 = vector.extract_strided_slice %158 {offsets = [0, 0], sizes = [1, 32], strides = [1, 1]} : vector<1x128xf32> to vector<1x32xf32>
    %160 = vector.broadcast %159 : vector<1x32xf32> to vector<2x32xf32>
    %161 = arith.addf %157, %160 : vector<2x32xf32>
    %cst_56 = arith.constant 0.000000e+00 : f32
    %162 = vector.broadcast %cst_56 : f32 to vector<2x32xf32>
    %163 = arith.maximumf %161, %162 : vector<2x32xf32>
    %c1080 = arith.constant 1080 : index
    %c0_57 = arith.constant 0 : index
    %164 = vector.load %arg1[%c1080, %c0_57] : memref<1360x128xf32, #tpu.memory_space<vmem>>, vector<32x128xf32>
    %165 = vector.extract_strided_slice %164 {offsets = [0, 0], sizes = [32, 32], strides = [1, 1]} : vector<32x128xf32> to vector<32x32xf32>
    %cst_58 = arith.constant dense<0.000000e+00> : vector<2x32xf32>
    %166 = tpu.matmul %163, %165, %cst_58 {dimension_numbers = #tpu.dot_dimension_numbers<[1], [0], [0], [1], [0, 0, 1, 1], [], []>} : vector<2x32xf32>, vector<32x32xf32>, vector<2x32xf32> -> vector<2x32xf32>
    %cst_59 = arith.constant dense<0.000000e+00> : vector<32xf32>
    %167 = vector.multi_reduction <add>, %166, %cst_59 [0] : vector<2x32xf32> to vector<32xf32>
    %168 = vector.shape_cast %167 : vector<32xf32> to vector<1x32xf32>
    %cst_60 = arith.constant 2.000000e+00 : f32
    %169 = vector.broadcast %cst_60 : f32 to vector<1x32xf32>
    %170 = arith.divf %168, %169 : vector<1x32xf32>
    %171 = vector.broadcast %170 : vector<1x32xf32> to vector<2x32xf32>
    %172 = arith.subf %166, %171 : vector<2x32xf32>
    %173 = arith.mulf %172, %172 : vector<2x32xf32>
    %cst_61 = arith.constant dense<0.000000e+00> : vector<32xf32>
    %174 = vector.multi_reduction <add>, %173, %cst_61 [0] : vector<2x32xf32> to vector<32xf32>
    %175 = vector.shape_cast %174 : vector<32xf32> to vector<1x32xf32>
    %cst_62 = arith.constant 2.000000e+00 : f32
    %176 = vector.broadcast %cst_62 : f32 to vector<1x32xf32>
    %177 = arith.divf %175, %176 : vector<1x32xf32>
    %cst_63 = arith.constant 9.99999974E-6 : f32
    %178 = vector.broadcast %cst_63 : f32 to vector<1x32xf32>
    %179 = arith.addf %177, %178 : vector<1x32xf32>
    %180 = math.rsqrt %179 : vector<1x32xf32>
    %181 = vector.broadcast %180 : vector<1x32xf32> to vector<2x32xf32>
    %182 = arith.mulf %172, %181 : vector<2x32xf32>
    %c1112 = arith.constant 1112 : index
    %c0_64 = arith.constant 0 : index
    %183 = vector.load %arg1[%c1112, %c0_64] : memref<1360x128xf32, #tpu.memory_space<vmem>>, vector<1x128xf32>
    %184 = vector.extract_strided_slice %183 {offsets = [0, 0], sizes = [1, 32], strides = [1, 1]} : vector<1x128xf32> to vector<1x32xf32>
    %185 = vector.broadcast %184 : vector<1x32xf32> to vector<2x32xf32>
    %186 = arith.mulf %182, %185 : vector<2x32xf32>
    %c1120 = arith.constant 1120 : index
    %c0_65 = arith.constant 0 : index
    %187 = vector.load %arg1[%c1120, %c0_65] : memref<1360x128xf32, #tpu.memory_space<vmem>>, vector<1x128xf32>
    %188 = vector.extract_strided_slice %187 {offsets = [0, 0], sizes = [1, 32], strides = [1, 1]} : vector<1x128xf32> to vector<1x32xf32>
    %189 = vector.broadcast %188 : vector<1x32xf32> to vector<2x32xf32>
    %190 = arith.addf %186, %189 : vector<2x32xf32>
    %cst_66 = arith.constant 0.000000e+00 : f32
    %191 = vector.broadcast %cst_66 : f32 to vector<2x32xf32>
    %192 = arith.maximumf %190, %191 : vector<2x32xf32>
    %c728 = arith.constant 728 : index
    %c0_67 = arith.constant 0 : index
    %193 = vector.load %arg1[%c728, %c0_67] : memref<1360x128xf32, #tpu.memory_space<vmem>>, vector<32x128xf32>
    %194 = vector.extract_strided_slice %193 {offsets = [0, 0], sizes = [32, 32], strides = [1, 1]} : vector<32x128xf32> to vector<32x32xf32>
    %cst_68 = arith.constant dense<0.000000e+00> : vector<2x32xf32>
    %195 = tpu.matmul %93, %194, %cst_68 {dimension_numbers = #tpu.dot_dimension_numbers<[1], [0], [0], [1], [0, 0, 1, 1], [], []>} : vector<2x32xf32>, vector<32x32xf32>, vector<2x32xf32> -> vector<2x32xf32>
    %c760 = arith.constant 760 : index
    %c0_69 = arith.constant 0 : index
    %196 = vector.load %arg1[%c760, %c0_69] : memref<1360x128xf32, #tpu.memory_space<vmem>>, vector<32x128xf32>
    %197 = vector.extract_strided_slice %196 {offsets = [0, 0], sizes = [32, 32], strides = [1, 1]} : vector<32x128xf32> to vector<32x32xf32>
    %cst_70 = arith.constant dense<0.000000e+00> : vector<2x32xf32>
    %198 = tpu.matmul %192, %197, %cst_70 {dimension_numbers = #tpu.dot_dimension_numbers<[1], [0], [0], [1], [0, 0, 1, 1], [], []>} : vector<2x32xf32>, vector<32x32xf32>, vector<2x32xf32> -> vector<2x32xf32>
    %199 = arith.addf %195, %198 : vector<2x32xf32>
    %c792 = arith.constant 792 : index
    %c0_71 = arith.constant 0 : index
    %200 = vector.load %arg1[%c792, %c0_71] : memref<1360x128xf32, #tpu.memory_space<vmem>>, vector<1x128xf32>
    %201 = vector.extract_strided_slice %200 {offsets = [0, 0], sizes = [1, 32], strides = [1, 1]} : vector<1x128xf32> to vector<1x32xf32>
    %202 = vector.broadcast %201 : vector<1x32xf32> to vector<2x32xf32>
    %203 = arith.addf %199, %202 : vector<2x32xf32>
    %cst_72 = arith.constant 0.000000e+00 : f32
    %204 = vector.broadcast %cst_72 : f32 to vector<2x32xf32>
    %205 = arith.maximumf %203, %204 : vector<2x32xf32>
    %c800 = arith.constant 800 : index
    %c0_73 = arith.constant 0 : index
    %206 = vector.load %arg1[%c800, %c0_73] : memref<1360x128xf32, #tpu.memory_space<vmem>>, vector<32x128xf32>
    %207 = vector.extract_strided_slice %206 {offsets = [0, 0], sizes = [32, 32], strides = [1, 1]} : vector<32x128xf32> to vector<32x32xf32>
    %cst_74 = arith.constant dense<0.000000e+00> : vector<2x32xf32>
    %208 = tpu.matmul %205, %207, %cst_74 {dimension_numbers = #tpu.dot_dimension_numbers<[1], [0], [0], [1], [0, 0, 1, 1], [], []>} : vector<2x32xf32>, vector<32x32xf32>, vector<2x32xf32> -> vector<2x32xf32>
    %c832 = arith.constant 832 : index
    %c0_75 = arith.constant 0 : index
    %209 = vector.load %arg1[%c832, %c0_75] : memref<1360x128xf32, #tpu.memory_space<vmem>>, vector<1x128xf32>
    %210 = vector.extract_strided_slice %209 {offsets = [0, 0], sizes = [1, 32], strides = [1, 1]} : vector<1x128xf32> to vector<1x32xf32>
    %211 = vector.broadcast %210 : vector<1x32xf32> to vector<2x32xf32>
    %212 = arith.addf %208, %211 : vector<2x32xf32>
    %cst_76 = arith.constant 0.000000e+00 : f32
    %213 = vector.broadcast %cst_76 : f32 to vector<2x32xf32>
    %214 = arith.maximumf %212, %213 : vector<2x32xf32>
    %c840 = arith.constant 840 : index
    %c0_77 = arith.constant 0 : index
    %215 = vector.load %arg1[%c840, %c0_77] : memref<1360x128xf32, #tpu.memory_space<vmem>>, vector<32x128xf32>
    %216 = vector.extract_strided_slice %215 {offsets = [0, 0], sizes = [32, 32], strides = [1, 1]} : vector<32x128xf32> to vector<32x32xf32>
    %cst_78 = arith.constant dense<0.000000e+00> : vector<2x32xf32>
    %217 = tpu.matmul %214, %216, %cst_78 {dimension_numbers = #tpu.dot_dimension_numbers<[1], [0], [0], [1], [0, 0, 1, 1], [], []>} : vector<2x32xf32>, vector<32x32xf32>, vector<2x32xf32> -> vector<2x32xf32>
    %c872 = arith.constant 872 : index
    %c0_79 = arith.constant 0 : index
    %218 = vector.load %arg1[%c872, %c0_79] : memref<1360x128xf32, #tpu.memory_space<vmem>>, vector<1x128xf32>
    %219 = vector.extract_strided_slice %218 {offsets = [0, 0], sizes = [1, 32], strides = [1, 1]} : vector<1x128xf32> to vector<1x32xf32>
    %220 = vector.broadcast %219 : vector<1x32xf32> to vector<2x32xf32>
    %221 = arith.addf %217, %220 : vector<2x32xf32>
    %222 = vector.extract_strided_slice %221 {offsets = [0, 0], sizes = [2, 16], strides = [1, 1]} : vector<2x32xf32> to vector<2x16xf32>
    %223 = vector.extract_strided_slice %221 {offsets = [0, 16], sizes = [2, 16], strides = [1, 1]} : vector<2x32xf32> to vector<2x16xf32>
    %c880 = arith.constant 880 : index
    %c0_80 = arith.constant 0 : index
    %224 = vector.load %arg1[%c880, %c0_80] : memref<1360x128xf32, #tpu.memory_space<vmem>>, vector<32x128xf32>
    %225 = vector.extract_strided_slice %224 {offsets = [0, 0], sizes = [32, 32], strides = [1, 1]} : vector<32x128xf32> to vector<32x32xf32>
    %cst_81 = arith.constant dense<0.000000e+00> : vector<2x32xf32>
    %226 = tpu.matmul %192, %225, %cst_81 {dimension_numbers = #tpu.dot_dimension_numbers<[1], [0], [0], [1], [0, 0, 1, 1], [], []>} : vector<2x32xf32>, vector<32x32xf32>, vector<2x32xf32> -> vector<2x32xf32>
    %c912 = arith.constant 912 : index
    %c0_82 = arith.constant 0 : index
    %227 = vector.load %arg1[%c912, %c0_82] : memref<1360x128xf32, #tpu.memory_space<vmem>>, vector<1x128xf32>
    %228 = vector.extract_strided_slice %227 {offsets = [0, 0], sizes = [1, 32], strides = [1, 1]} : vector<1x128xf32> to vector<1x32xf32>
    %229 = vector.broadcast %228 : vector<1x32xf32> to vector<2x32xf32>
    %230 = arith.addf %226, %229 : vector<2x32xf32>
    %cst_83 = arith.constant 0.000000e+00 : f32
    %231 = vector.broadcast %cst_83 : f32 to vector<2x32xf32>
    %232 = arith.maximumf %230, %231 : vector<2x32xf32>
    %c920 = arith.constant 920 : index
    %c0_84 = arith.constant 0 : index
    %233 = vector.load %arg1[%c920, %c0_84] : memref<1360x128xf32, #tpu.memory_space<vmem>>, vector<32x128xf32>
    %234 = vector.extract_strided_slice %233 {offsets = [0, 0], sizes = [32, 32], strides = [1, 1]} : vector<32x128xf32> to vector<32x32xf32>
    %cst_85 = arith.constant dense<0.000000e+00> : vector<2x32xf32>
    %235 = tpu.matmul %232, %234, %cst_85 {dimension_numbers = #tpu.dot_dimension_numbers<[1], [0], [0], [1], [0, 0, 1, 1], [], []>} : vector<2x32xf32>, vector<32x32xf32>, vector<2x32xf32> -> vector<2x32xf32>
    %c952 = arith.constant 952 : index
    %c0_86 = arith.constant 0 : index
    %236 = vector.load %arg1[%c952, %c0_86] : memref<1360x128xf32, #tpu.memory_space<vmem>>, vector<1x128xf32>
    %237 = vector.extract_strided_slice %236 {offsets = [0, 0], sizes = [1, 32], strides = [1, 1]} : vector<1x128xf32> to vector<1x32xf32>
    %238 = vector.broadcast %237 : vector<1x32xf32> to vector<2x32xf32>
    %239 = arith.addf %235, %238 : vector<2x32xf32>
    %cst_87 = arith.constant 0.000000e+00 : f32
    %240 = vector.broadcast %cst_87 : f32 to vector<2x32xf32>
    %241 = arith.maximumf %239, %240 : vector<2x32xf32>
    %c960 = arith.constant 960 : index
    %c0_88 = arith.constant 0 : index
    %242 = vector.load %arg1[%c960, %c0_88] : memref<1360x128xf32, #tpu.memory_space<vmem>>, vector<32x128xf32>
    %243 = vector.extract_strided_slice %242 {offsets = [0, 0], sizes = [32, 32], strides = [1, 1]} : vector<32x128xf32> to vector<32x32xf32>
    %cst_89 = arith.constant dense<0.000000e+00> : vector<2x32xf32>
    %244 = tpu.matmul %241, %243, %cst_89 {dimension_numbers = #tpu.dot_dimension_numbers<[1], [0], [0], [1], [0, 0, 1, 1], [], []>} : vector<2x32xf32>, vector<32x32xf32>, vector<2x32xf32> -> vector<2x32xf32>
    %c992 = arith.constant 992 : index
    %c0_90 = arith.constant 0 : index
    %245 = vector.load %arg1[%c992, %c0_90] : memref<1360x128xf32, #tpu.memory_space<vmem>>, vector<1x128xf32>
    %246 = vector.extract_strided_slice %245 {offsets = [0, 0], sizes = [1, 32], strides = [1, 1]} : vector<1x128xf32> to vector<1x32xf32>
    %247 = vector.broadcast %246 : vector<1x32xf32> to vector<2x32xf32>
    %248 = arith.addf %244, %247 : vector<2x32xf32>
    %cst_91 = arith.constant 5.000000e-01 : f32
    %249 = vector.broadcast %cst_91 : f32 to vector<2x16xf32>
    %250 = arith.mulf %249, %223 : vector<2x16xf32>
    %251 = math.exp %250 : vector<2x16xf32>
    %252 = arith.mulf %3, %251 : vector<2x16xf32>
    %253 = arith.addf %222, %252 : vector<2x16xf32>
    %c616 = arith.constant 616 : index
    %c0_92 = arith.constant 0 : index
    %254 = vector.load %arg1[%c616, %c0_92] : memref<1360x128xf32, #tpu.memory_space<vmem>>, vector<32x128xf32>
    %255 = vector.extract_strided_slice %254 {offsets = [0, 0], sizes = [32, 32], strides = [1, 1]} : vector<32x128xf32> to vector<32x32xf32>
    %cst_93 = arith.constant dense<0.000000e+00> : vector<2x32xf32>
    %256 = tpu.matmul %192, %255, %cst_93 {dimension_numbers = #tpu.dot_dimension_numbers<[1], [0], [0], [1], [0, 0, 1, 1], [], []>} : vector<2x32xf32>, vector<32x32xf32>, vector<2x32xf32> -> vector<2x32xf32>
    %c648 = arith.constant 648 : index
    %c0_94 = arith.constant 0 : index
    %257 = vector.load %arg1[%c648, %c0_94] : memref<1360x128xf32, #tpu.memory_space<vmem>>, vector<16x128xf32>
    %258 = vector.extract_strided_slice %257 {offsets = [0, 0], sizes = [16, 32], strides = [1, 1]} : vector<16x128xf32> to vector<16x32xf32>
    %cst_95 = arith.constant dense<0.000000e+00> : vector<2x32xf32>
    %259 = tpu.matmul %253, %258, %cst_95 {dimension_numbers = #tpu.dot_dimension_numbers<[1], [0], [0], [1], [0, 0, 1, 1], [], []>} : vector<2x16xf32>, vector<16x32xf32>, vector<2x32xf32> -> vector<2x32xf32>
    %260 = arith.addf %256, %259 : vector<2x32xf32>
    %cst_96 = arith.constant dense<0.000000e+00> : vector<32xf32>
    %261 = vector.multi_reduction <add>, %260, %cst_96 [0] : vector<2x32xf32> to vector<32xf32>
    %262 = vector.shape_cast %261 : vector<32xf32> to vector<1x32xf32>
    %cst_97 = arith.constant 2.000000e+00 : f32
    %263 = vector.broadcast %cst_97 : f32 to vector<1x32xf32>
    %264 = arith.divf %262, %263 : vector<1x32xf32>
    %265 = vector.broadcast %264 : vector<1x32xf32> to vector<2x32xf32>
    %266 = arith.subf %260, %265 : vector<2x32xf32>
    %267 = arith.mulf %266, %266 : vector<2x32xf32>
    %cst_98 = arith.constant dense<0.000000e+00> : vector<32xf32>
    %268 = vector.multi_reduction <add>, %267, %cst_98 [0] : vector<2x32xf32> to vector<32xf32>
    %269 = vector.shape_cast %268 : vector<32xf32> to vector<1x32xf32>
    %cst_99 = arith.constant 2.000000e+00 : f32
    %270 = vector.broadcast %cst_99 : f32 to vector<1x32xf32>
    %271 = arith.divf %269, %270 : vector<1x32xf32>
    %cst_100 = arith.constant 9.99999974E-6 : f32
    %272 = vector.broadcast %cst_100 : f32 to vector<1x32xf32>
    %273 = arith.addf %271, %272 : vector<1x32xf32>
    %274 = math.rsqrt %273 : vector<1x32xf32>
    %275 = vector.broadcast %274 : vector<1x32xf32> to vector<2x32xf32>
    %276 = arith.mulf %266, %275 : vector<2x32xf32>
    %c664 = arith.constant 664 : index
    %c0_101 = arith.constant 0 : index
    %277 = vector.load %arg1[%c664, %c0_101] : memref<1360x128xf32, #tpu.memory_space<vmem>>, vector<1x128xf32>
    %278 = vector.extract_strided_slice %277 {offsets = [0, 0], sizes = [1, 32], strides = [1, 1]} : vector<1x128xf32> to vector<1x32xf32>
    %279 = vector.broadcast %278 : vector<1x32xf32> to vector<2x32xf32>
    %280 = arith.mulf %276, %279 : vector<2x32xf32>
    %c672 = arith.constant 672 : index
    %c0_102 = arith.constant 0 : index
    %281 = vector.load %arg1[%c672, %c0_102] : memref<1360x128xf32, #tpu.memory_space<vmem>>, vector<1x128xf32>
    %282 = vector.extract_strided_slice %281 {offsets = [0, 0], sizes = [1, 32], strides = [1, 1]} : vector<1x128xf32> to vector<1x32xf32>
    %283 = vector.broadcast %282 : vector<1x32xf32> to vector<2x32xf32>
    %284 = arith.addf %280, %283 : vector<2x32xf32>
    %cst_103 = arith.constant 0.000000e+00 : f32
    %285 = vector.broadcast %cst_103 : f32 to vector<2x32xf32>
    %286 = arith.maximumf %284, %285 : vector<2x32xf32>
    %c680 = arith.constant 680 : index
    %c0_104 = arith.constant 0 : index
    %287 = vector.load %arg1[%c680, %c0_104] : memref<1360x128xf32, #tpu.memory_space<vmem>>, vector<32x128xf32>
    %288 = vector.extract_strided_slice %287 {offsets = [0, 0], sizes = [32, 32], strides = [1, 1]} : vector<32x128xf32> to vector<32x32xf32>
    %cst_105 = arith.constant dense<0.000000e+00> : vector<2x32xf32>
    %289 = tpu.matmul %286, %288, %cst_105 {dimension_numbers = #tpu.dot_dimension_numbers<[1], [0], [0], [1], [0, 0, 1, 1], [], []>} : vector<2x32xf32>, vector<32x32xf32>, vector<2x32xf32> -> vector<2x32xf32>
    %cst_106 = arith.constant dense<0.000000e+00> : vector<32xf32>
    %290 = vector.multi_reduction <add>, %289, %cst_106 [0] : vector<2x32xf32> to vector<32xf32>
    %291 = vector.shape_cast %290 : vector<32xf32> to vector<1x32xf32>
    %cst_107 = arith.constant 2.000000e+00 : f32
    %292 = vector.broadcast %cst_107 : f32 to vector<1x32xf32>
    %293 = arith.divf %291, %292 : vector<1x32xf32>
    %294 = vector.broadcast %293 : vector<1x32xf32> to vector<2x32xf32>
    %295 = arith.subf %289, %294 : vector<2x32xf32>
    %296 = arith.mulf %295, %295 : vector<2x32xf32>
    %cst_108 = arith.constant dense<0.000000e+00> : vector<32xf32>
    %297 = vector.multi_reduction <add>, %296, %cst_108 [0] : vector<2x32xf32> to vector<32xf32>
    %298 = vector.shape_cast %297 : vector<32xf32> to vector<1x32xf32>
    %cst_109 = arith.constant 2.000000e+00 : f32
    %299 = vector.broadcast %cst_109 : f32 to vector<1x32xf32>
    %300 = arith.divf %298, %299 : vector<1x32xf32>
    %cst_110 = arith.constant 9.99999974E-6 : f32
    %301 = vector.broadcast %cst_110 : f32 to vector<1x32xf32>
    %302 = arith.addf %300, %301 : vector<1x32xf32>
    %303 = math.rsqrt %302 : vector<1x32xf32>
    %304 = vector.broadcast %303 : vector<1x32xf32> to vector<2x32xf32>
    %305 = arith.mulf %295, %304 : vector<2x32xf32>
    %c712 = arith.constant 712 : index
    %c0_111 = arith.constant 0 : index
    %306 = vector.load %arg1[%c712, %c0_111] : memref<1360x128xf32, #tpu.memory_space<vmem>>, vector<1x128xf32>
    %307 = vector.extract_strided_slice %306 {offsets = [0, 0], sizes = [1, 32], strides = [1, 1]} : vector<1x128xf32> to vector<1x32xf32>
    %308 = vector.broadcast %307 : vector<1x32xf32> to vector<2x32xf32>
    %309 = arith.mulf %305, %308 : vector<2x32xf32>
    %c720 = arith.constant 720 : index
    %c0_112 = arith.constant 0 : index
    %310 = vector.load %arg1[%c720, %c0_112] : memref<1360x128xf32, #tpu.memory_space<vmem>>, vector<1x128xf32>
    %311 = vector.extract_strided_slice %310 {offsets = [0, 0], sizes = [1, 32], strides = [1, 1]} : vector<1x128xf32> to vector<1x32xf32>
    %312 = vector.broadcast %311 : vector<1x32xf32> to vector<2x32xf32>
    %313 = arith.addf %309, %312 : vector<2x32xf32>
    %cst_113 = arith.constant 0.000000e+00 : f32
    %314 = vector.broadcast %cst_113 : f32 to vector<2x32xf32>
    %315 = arith.maximumf %313, %314 : vector<2x32xf32>
    %c344 = arith.constant 344 : index
    %c0_114 = arith.constant 0 : index
    %316 = vector.load %arg1[%c344, %c0_114] : memref<1360x128xf32, #tpu.memory_space<vmem>>, vector<32x128xf32>
    %317 = vector.extract_strided_slice %316 {offsets = [0, 0], sizes = [32, 32], strides = [1, 1]} : vector<32x128xf32> to vector<32x32xf32>
    %cst_115 = arith.constant dense<0.000000e+00> : vector<2x32xf32>
    %318 = tpu.matmul %92, %317, %cst_115 {dimension_numbers = #tpu.dot_dimension_numbers<[1], [0], [0], [1], [0, 0, 1, 1], [], []>} : vector<2x32xf32>, vector<32x32xf32>, vector<2x32xf32> -> vector<2x32xf32>
    %c376 = arith.constant 376 : index
    %c0_116 = arith.constant 0 : index
    %319 = vector.load %arg1[%c376, %c0_116] : memref<1360x128xf32, #tpu.memory_space<vmem>>, vector<32x128xf32>
    %320 = vector.extract_strided_slice %319 {offsets = [0, 0], sizes = [32, 32], strides = [1, 1]} : vector<32x128xf32> to vector<32x32xf32>
    %cst_117 = arith.constant dense<0.000000e+00> : vector<2x32xf32>
    %321 = tpu.matmul %315, %320, %cst_117 {dimension_numbers = #tpu.dot_dimension_numbers<[1], [0], [0], [1], [0, 0, 1, 1], [], []>} : vector<2x32xf32>, vector<32x32xf32>, vector<2x32xf32> -> vector<2x32xf32>
    %322 = arith.addf %318, %321 : vector<2x32xf32>
    %c408 = arith.constant 408 : index
    %c0_118 = arith.constant 0 : index
    %323 = vector.load %arg1[%c408, %c0_118] : memref<1360x128xf32, #tpu.memory_space<vmem>>, vector<1x128xf32>
    %324 = vector.extract_strided_slice %323 {offsets = [0, 0], sizes = [1, 32], strides = [1, 1]} : vector<1x128xf32> to vector<1x32xf32>
    %325 = vector.broadcast %324 : vector<1x32xf32> to vector<2x32xf32>
    %326 = arith.addf %322, %325 : vector<2x32xf32>
    %cst_119 = arith.constant 0.000000e+00 : f32
    %327 = vector.broadcast %cst_119 : f32 to vector<2x32xf32>
    %328 = arith.maximumf %326, %327 : vector<2x32xf32>
    %c416 = arith.constant 416 : index
    %c0_120 = arith.constant 0 : index
    %329 = vector.load %arg1[%c416, %c0_120] : memref<1360x128xf32, #tpu.memory_space<vmem>>, vector<32x128xf32>
    %330 = vector.extract_strided_slice %329 {offsets = [0, 0], sizes = [32, 32], strides = [1, 1]} : vector<32x128xf32> to vector<32x32xf32>
    %cst_121 = arith.constant dense<0.000000e+00> : vector<2x32xf32>
    %331 = tpu.matmul %328, %330, %cst_121 {dimension_numbers = #tpu.dot_dimension_numbers<[1], [0], [0], [1], [0, 0, 1, 1], [], []>} : vector<2x32xf32>, vector<32x32xf32>, vector<2x32xf32> -> vector<2x32xf32>
    %c448 = arith.constant 448 : index
    %c0_122 = arith.constant 0 : index
    %332 = vector.load %arg1[%c448, %c0_122] : memref<1360x128xf32, #tpu.memory_space<vmem>>, vector<1x128xf32>
    %333 = vector.extract_strided_slice %332 {offsets = [0, 0], sizes = [1, 32], strides = [1, 1]} : vector<1x128xf32> to vector<1x32xf32>
    %334 = vector.broadcast %333 : vector<1x32xf32> to vector<2x32xf32>
    %335 = arith.addf %331, %334 : vector<2x32xf32>
    %cst_123 = arith.constant 0.000000e+00 : f32
    %336 = vector.broadcast %cst_123 : f32 to vector<2x32xf32>
    %337 = arith.maximumf %335, %336 : vector<2x32xf32>
    %c456 = arith.constant 456 : index
    %c0_124 = arith.constant 0 : index
    %338 = vector.load %arg1[%c456, %c0_124] : memref<1360x128xf32, #tpu.memory_space<vmem>>, vector<32x128xf32>
    %339 = vector.extract_strided_slice %338 {offsets = [0, 0], sizes = [32, 16], strides = [1, 1]} : vector<32x128xf32> to vector<32x16xf32>
    %cst_125 = arith.constant dense<0.000000e+00> : vector<2x16xf32>
    %340 = tpu.matmul %337, %339, %cst_125 {dimension_numbers = #tpu.dot_dimension_numbers<[1], [0], [0], [1], [0, 0, 1, 1], [], []>} : vector<2x32xf32>, vector<32x16xf32>, vector<2x16xf32> -> vector<2x16xf32>
    %c488 = arith.constant 488 : index
    %c0_126 = arith.constant 0 : index
    %341 = vector.load %arg1[%c488, %c0_126] : memref<1360x128xf32, #tpu.memory_space<vmem>>, vector<1x128xf32>
    %342 = vector.extract_strided_slice %341 {offsets = [0, 0], sizes = [1, 16], strides = [1, 1]} : vector<1x128xf32> to vector<1x16xf32>
    %343 = vector.broadcast %342 : vector<1x16xf32> to vector<2x16xf32>
    %344 = arith.addf %340, %343 : vector<2x16xf32>
    %345 = vector.extract_strided_slice %344 {offsets = [0, 0], sizes = [2, 8], strides = [1, 1]} : vector<2x16xf32> to vector<2x8xf32>
    %346 = vector.extract_strided_slice %344 {offsets = [0, 8], sizes = [2, 8], strides = [1, 1]} : vector<2x16xf32> to vector<2x8xf32>
    %c496 = arith.constant 496 : index
    %c0_127 = arith.constant 0 : index
    %347 = vector.load %arg1[%c496, %c0_127] : memref<1360x128xf32, #tpu.memory_space<vmem>>, vector<32x128xf32>
    %348 = vector.extract_strided_slice %347 {offsets = [0, 0], sizes = [32, 32], strides = [1, 1]} : vector<32x128xf32> to vector<32x32xf32>
    %cst_128 = arith.constant dense<0.000000e+00> : vector<2x32xf32>
    %349 = tpu.matmul %315, %348, %cst_128 {dimension_numbers = #tpu.dot_dimension_numbers<[1], [0], [0], [1], [0, 0, 1, 1], [], []>} : vector<2x32xf32>, vector<32x32xf32>, vector<2x32xf32> -> vector<2x32xf32>
    %c528 = arith.constant 528 : index
    %c0_129 = arith.constant 0 : index
    %350 = vector.load %arg1[%c528, %c0_129] : memref<1360x128xf32, #tpu.memory_space<vmem>>, vector<1x128xf32>
    %351 = vector.extract_strided_slice %350 {offsets = [0, 0], sizes = [1, 32], strides = [1, 1]} : vector<1x128xf32> to vector<1x32xf32>
    %352 = vector.broadcast %351 : vector<1x32xf32> to vector<2x32xf32>
    %353 = arith.addf %349, %352 : vector<2x32xf32>
    %cst_130 = arith.constant 0.000000e+00 : f32
    %354 = vector.broadcast %cst_130 : f32 to vector<2x32xf32>
    %355 = arith.maximumf %353, %354 : vector<2x32xf32>
    %c536 = arith.constant 536 : index
    %c0_131 = arith.constant 0 : index
    %356 = vector.load %arg1[%c536, %c0_131] : memref<1360x128xf32, #tpu.memory_space<vmem>>, vector<32x128xf32>
    %357 = vector.extract_strided_slice %356 {offsets = [0, 0], sizes = [32, 32], strides = [1, 1]} : vector<32x128xf32> to vector<32x32xf32>
    %cst_132 = arith.constant dense<0.000000e+00> : vector<2x32xf32>
    %358 = tpu.matmul %355, %357, %cst_132 {dimension_numbers = #tpu.dot_dimension_numbers<[1], [0], [0], [1], [0, 0, 1, 1], [], []>} : vector<2x32xf32>, vector<32x32xf32>, vector<2x32xf32> -> vector<2x32xf32>
    %c568 = arith.constant 568 : index
    %c0_133 = arith.constant 0 : index
    %359 = vector.load %arg1[%c568, %c0_133] : memref<1360x128xf32, #tpu.memory_space<vmem>>, vector<1x128xf32>
    %360 = vector.extract_strided_slice %359 {offsets = [0, 0], sizes = [1, 32], strides = [1, 1]} : vector<1x128xf32> to vector<1x32xf32>
    %361 = vector.broadcast %360 : vector<1x32xf32> to vector<2x32xf32>
    %362 = arith.addf %358, %361 : vector<2x32xf32>
    %cst_134 = arith.constant 0.000000e+00 : f32
    %363 = vector.broadcast %cst_134 : f32 to vector<2x32xf32>
    %364 = arith.maximumf %362, %363 : vector<2x32xf32>
    %c576 = arith.constant 576 : index
    %c0_135 = arith.constant 0 : index
    %365 = vector.load %arg1[%c576, %c0_135] : memref<1360x128xf32, #tpu.memory_space<vmem>>, vector<32x128xf32>
    %366 = vector.extract_strided_slice %365 {offsets = [0, 0], sizes = [32, 16], strides = [1, 1]} : vector<32x128xf32> to vector<32x16xf32>
    %cst_136 = arith.constant dense<0.000000e+00> : vector<2x16xf32>
    %367 = tpu.matmul %364, %366, %cst_136 {dimension_numbers = #tpu.dot_dimension_numbers<[1], [0], [0], [1], [0, 0, 1, 1], [], []>} : vector<2x32xf32>, vector<32x16xf32>, vector<2x16xf32> -> vector<2x16xf32>
    %c608 = arith.constant 608 : index
    %c0_137 = arith.constant 0 : index
    %368 = vector.load %arg1[%c608, %c0_137] : memref<1360x128xf32, #tpu.memory_space<vmem>>, vector<1x128xf32>
    %369 = vector.extract_strided_slice %368 {offsets = [0, 0], sizes = [1, 16], strides = [1, 1]} : vector<1x128xf32> to vector<1x16xf32>
    %370 = vector.broadcast %369 : vector<1x16xf32> to vector<2x16xf32>
    %371 = arith.addf %367, %370 : vector<2x16xf32>
    %cst_138 = arith.constant 5.000000e-01 : f32
    %372 = vector.broadcast %cst_138 : f32 to vector<2x8xf32>
    %373 = arith.mulf %372, %346 : vector<2x8xf32>
    %374 = math.exp %373 : vector<2x8xf32>
    %375 = arith.mulf %2, %374 : vector<2x8xf32>
    %376 = arith.addf %345, %375 : vector<2x8xf32>
    %c616_139 = arith.constant 616 : index
    %c0_140 = arith.constant 0 : index
    %377 = vector.load %arg1[%c616_139, %c0_140] : memref<1360x128xf32, #tpu.memory_space<vmem>>, vector<32x128xf32>
    %378 = vector.extract_strided_slice %377 {offsets = [0, 0], sizes = [32, 32], strides = [1, 1]} : vector<32x128xf32> to vector<32x32xf32>
    %cst_141 = arith.constant dense<0.000000e+00> : vector<2x32xf32>
    %379 = tpu.matmul %130, %378, %cst_141 {dimension_numbers = #tpu.dot_dimension_numbers<[1], [0], [0], [1], [0, 0, 1, 1], [], []>} : vector<2x32xf32>, vector<32x32xf32>, vector<2x32xf32> -> vector<2x32xf32>
    %c648_142 = arith.constant 648 : index
    %c0_143 = arith.constant 0 : index
    %380 = vector.load %arg1[%c648_142, %c0_143] : memref<1360x128xf32, #tpu.memory_space<vmem>>, vector<16x128xf32>
    %381 = vector.extract_strided_slice %380 {offsets = [0, 0], sizes = [16, 32], strides = [1, 1]} : vector<16x128xf32> to vector<16x32xf32>
    %cst_144 = arith.constant dense<0.000000e+00> : vector<2x32xf32>
    %382 = tpu.matmul %253, %381, %cst_144 {dimension_numbers = #tpu.dot_dimension_numbers<[1], [0], [0], [1], [0, 0, 1, 1], [], []>} : vector<2x16xf32>, vector<16x32xf32>, vector<2x32xf32> -> vector<2x32xf32>
    %383 = arith.addf %379, %382 : vector<2x32xf32>
    %cst_145 = arith.constant dense<0.000000e+00> : vector<32xf32>
    %384 = vector.multi_reduction <add>, %383, %cst_145 [0] : vector<2x32xf32> to vector<32xf32>
    %385 = vector.shape_cast %384 : vector<32xf32> to vector<1x32xf32>
    %cst_146 = arith.constant 2.000000e+00 : f32
    %386 = vector.broadcast %cst_146 : f32 to vector<1x32xf32>
    %387 = arith.divf %385, %386 : vector<1x32xf32>
    %388 = vector.broadcast %387 : vector<1x32xf32> to vector<2x32xf32>
    %389 = arith.subf %383, %388 : vector<2x32xf32>
    %390 = arith.mulf %389, %389 : vector<2x32xf32>
    %cst_147 = arith.constant dense<0.000000e+00> : vector<32xf32>
    %391 = vector.multi_reduction <add>, %390, %cst_147 [0] : vector<2x32xf32> to vector<32xf32>
    %392 = vector.shape_cast %391 : vector<32xf32> to vector<1x32xf32>
    %cst_148 = arith.constant 2.000000e+00 : f32
    %393 = vector.broadcast %cst_148 : f32 to vector<1x32xf32>
    %394 = arith.divf %392, %393 : vector<1x32xf32>
    %cst_149 = arith.constant 9.99999974E-6 : f32
    %395 = vector.broadcast %cst_149 : f32 to vector<1x32xf32>
    %396 = arith.addf %394, %395 : vector<1x32xf32>
    %397 = math.rsqrt %396 : vector<1x32xf32>
    %398 = vector.broadcast %397 : vector<1x32xf32> to vector<2x32xf32>
    %399 = arith.mulf %389, %398 : vector<2x32xf32>
    %c664_150 = arith.constant 664 : index
    %c0_151 = arith.constant 0 : index
    %400 = vector.load %arg1[%c664_150, %c0_151] : memref<1360x128xf32, #tpu.memory_space<vmem>>, vector<1x128xf32>
    %401 = vector.extract_strided_slice %400 {offsets = [0, 0], sizes = [1, 32], strides = [1, 1]} : vector<1x128xf32> to vector<1x32xf32>
    %402 = vector.broadcast %401 : vector<1x32xf32> to vector<2x32xf32>
    %403 = arith.mulf %399, %402 : vector<2x32xf32>
    %c672_152 = arith.constant 672 : index
    %c0_153 = arith.constant 0 : index
    %404 = vector.load %arg1[%c672_152, %c0_153] : memref<1360x128xf32, #tpu.memory_space<vmem>>, vector<1x128xf32>
    %405 = vector.extract_strided_slice %404 {offsets = [0, 0], sizes = [1, 32], strides = [1, 1]} : vector<1x128xf32> to vector<1x32xf32>
    %406 = vector.broadcast %405 : vector<1x32xf32> to vector<2x32xf32>
    %407 = arith.addf %403, %406 : vector<2x32xf32>
    %cst_154 = arith.constant 0.000000e+00 : f32
    %408 = vector.broadcast %cst_154 : f32 to vector<2x32xf32>
    %409 = arith.maximumf %407, %408 : vector<2x32xf32>
    %c680_155 = arith.constant 680 : index
    %c0_156 = arith.constant 0 : index
    %410 = vector.load %arg1[%c680_155, %c0_156] : memref<1360x128xf32, #tpu.memory_space<vmem>>, vector<32x128xf32>
    %411 = vector.extract_strided_slice %410 {offsets = [0, 0], sizes = [32, 32], strides = [1, 1]} : vector<32x128xf32> to vector<32x32xf32>
    %cst_157 = arith.constant dense<0.000000e+00> : vector<2x32xf32>
    %412 = tpu.matmul %409, %411, %cst_157 {dimension_numbers = #tpu.dot_dimension_numbers<[1], [0], [0], [1], [0, 0, 1, 1], [], []>} : vector<2x32xf32>, vector<32x32xf32>, vector<2x32xf32> -> vector<2x32xf32>
    %cst_158 = arith.constant dense<0.000000e+00> : vector<32xf32>
    %413 = vector.multi_reduction <add>, %412, %cst_158 [0] : vector<2x32xf32> to vector<32xf32>
    %414 = vector.shape_cast %413 : vector<32xf32> to vector<1x32xf32>
    %cst_159 = arith.constant 2.000000e+00 : f32
    %415 = vector.broadcast %cst_159 : f32 to vector<1x32xf32>
    %416 = arith.divf %414, %415 : vector<1x32xf32>
    %417 = vector.broadcast %416 : vector<1x32xf32> to vector<2x32xf32>
    %418 = arith.subf %412, %417 : vector<2x32xf32>
    %419 = arith.mulf %418, %418 : vector<2x32xf32>
    %cst_160 = arith.constant dense<0.000000e+00> : vector<32xf32>
    %420 = vector.multi_reduction <add>, %419, %cst_160 [0] : vector<2x32xf32> to vector<32xf32>
    %421 = vector.shape_cast %420 : vector<32xf32> to vector<1x32xf32>
    %cst_161 = arith.constant 2.000000e+00 : f32
    %422 = vector.broadcast %cst_161 : f32 to vector<1x32xf32>
    %423 = arith.divf %421, %422 : vector<1x32xf32>
    %cst_162 = arith.constant 9.99999974E-6 : f32
    %424 = vector.broadcast %cst_162 : f32 to vector<1x32xf32>
    %425 = arith.addf %423, %424 : vector<1x32xf32>
    %426 = math.rsqrt %425 : vector<1x32xf32>
    %427 = vector.broadcast %426 : vector<1x32xf32> to vector<2x32xf32>
    %428 = arith.mulf %418, %427 : vector<2x32xf32>
    %c712_163 = arith.constant 712 : index
    %c0_164 = arith.constant 0 : index
    %429 = vector.load %arg1[%c712_163, %c0_164] : memref<1360x128xf32, #tpu.memory_space<vmem>>, vector<1x128xf32>
    %430 = vector.extract_strided_slice %429 {offsets = [0, 0], sizes = [1, 32], strides = [1, 1]} : vector<1x128xf32> to vector<1x32xf32>
    %431 = vector.broadcast %430 : vector<1x32xf32> to vector<2x32xf32>
    %432 = arith.mulf %428, %431 : vector<2x32xf32>
    %c720_165 = arith.constant 720 : index
    %c0_166 = arith.constant 0 : index
    %433 = vector.load %arg1[%c720_165, %c0_166] : memref<1360x128xf32, #tpu.memory_space<vmem>>, vector<1x128xf32>
    %434 = vector.extract_strided_slice %433 {offsets = [0, 0], sizes = [1, 32], strides = [1, 1]} : vector<1x128xf32> to vector<1x32xf32>
    %435 = vector.broadcast %434 : vector<1x32xf32> to vector<2x32xf32>
    %436 = arith.addf %432, %435 : vector<2x32xf32>
    %cst_167 = arith.constant 0.000000e+00 : f32
    %437 = vector.broadcast %cst_167 : f32 to vector<2x32xf32>
    %438 = arith.maximumf %436, %437 : vector<2x32xf32>
    %c240 = arith.constant 240 : index
    %c0_168 = arith.constant 0 : index
    %439 = vector.load %arg1[%c240, %c0_168] : memref<1360x128xf32, #tpu.memory_space<vmem>>, vector<32x128xf32>
    %440 = vector.extract_strided_slice %439 {offsets = [0, 0], sizes = [32, 32], strides = [1, 1]} : vector<32x128xf32> to vector<32x32xf32>
    %cst_169 = arith.constant dense<0.000000e+00> : vector<2x32xf32>
    %441 = tpu.matmul %438, %440, %cst_169 {dimension_numbers = #tpu.dot_dimension_numbers<[1], [0], [0], [1], [0, 0, 1, 1], [], []>} : vector<2x32xf32>, vector<32x32xf32>, vector<2x32xf32> -> vector<2x32xf32>
    %c272 = arith.constant 272 : index
    %c0_170 = arith.constant 0 : index
    %442 = vector.load %arg1[%c272, %c0_170] : memref<1360x128xf32, #tpu.memory_space<vmem>>, vector<8x128xf32>
    %443 = vector.extract_strided_slice %442 {offsets = [0, 0], sizes = [8, 32], strides = [1, 1]} : vector<8x128xf32> to vector<8x32xf32>
    %cst_171 = arith.constant dense<0.000000e+00> : vector<2x32xf32>
    %444 = tpu.matmul %376, %443, %cst_171 {dimension_numbers = #tpu.dot_dimension_numbers<[1], [0], [0], [1], [0, 0, 1, 1], [], []>} : vector<2x8xf32>, vector<8x32xf32>, vector<2x32xf32> -> vector<2x32xf32>
    %445 = arith.addf %441, %444 : vector<2x32xf32>
    %cst_172 = arith.constant dense<0.000000e+00> : vector<32xf32>
    %446 = vector.multi_reduction <add>, %445, %cst_172 [0] : vector<2x32xf32> to vector<32xf32>
    %447 = vector.shape_cast %446 : vector<32xf32> to vector<1x32xf32>
    %cst_173 = arith.constant 2.000000e+00 : f32
    %448 = vector.broadcast %cst_173 : f32 to vector<1x32xf32>
    %449 = arith.divf %447, %448 : vector<1x32xf32>
    %450 = vector.broadcast %449 : vector<1x32xf32> to vector<2x32xf32>
    %451 = arith.subf %445, %450 : vector<2x32xf32>
    %452 = arith.mulf %451, %451 : vector<2x32xf32>
    %cst_174 = arith.constant dense<0.000000e+00> : vector<32xf32>
    %453 = vector.multi_reduction <add>, %452, %cst_174 [0] : vector<2x32xf32> to vector<32xf32>
    %454 = vector.shape_cast %453 : vector<32xf32> to vector<1x32xf32>
    %cst_175 = arith.constant 2.000000e+00 : f32
    %455 = vector.broadcast %cst_175 : f32 to vector<1x32xf32>
    %456 = arith.divf %454, %455 : vector<1x32xf32>
    %cst_176 = arith.constant 9.99999974E-6 : f32
    %457 = vector.broadcast %cst_176 : f32 to vector<1x32xf32>
    %458 = arith.addf %456, %457 : vector<1x32xf32>
    %459 = math.rsqrt %458 : vector<1x32xf32>
    %460 = vector.broadcast %459 : vector<1x32xf32> to vector<2x32xf32>
    %461 = arith.mulf %451, %460 : vector<2x32xf32>
    %c280 = arith.constant 280 : index
    %c0_177 = arith.constant 0 : index
    %462 = vector.load %arg1[%c280, %c0_177] : memref<1360x128xf32, #tpu.memory_space<vmem>>, vector<1x128xf32>
    %463 = vector.extract_strided_slice %462 {offsets = [0, 0], sizes = [1, 32], strides = [1, 1]} : vector<1x128xf32> to vector<1x32xf32>
    %464 = vector.broadcast %463 : vector<1x32xf32> to vector<2x32xf32>
    %465 = arith.mulf %461, %464 : vector<2x32xf32>
    %c288 = arith.constant 288 : index
    %c0_178 = arith.constant 0 : index
    %466 = vector.load %arg1[%c288, %c0_178] : memref<1360x128xf32, #tpu.memory_space<vmem>>, vector<1x128xf32>
    %467 = vector.extract_strided_slice %466 {offsets = [0, 0], sizes = [1, 32], strides = [1, 1]} : vector<1x128xf32> to vector<1x32xf32>
    %468 = vector.broadcast %467 : vector<1x32xf32> to vector<2x32xf32>
    %469 = arith.addf %465, %468 : vector<2x32xf32>
    %cst_179 = arith.constant 0.000000e+00 : f32
    %470 = vector.broadcast %cst_179 : f32 to vector<2x32xf32>
    %471 = arith.maximumf %469, %470 : vector<2x32xf32>
    %c296 = arith.constant 296 : index
    %c0_180 = arith.constant 0 : index
    %472 = vector.load %arg1[%c296, %c0_180] : memref<1360x128xf32, #tpu.memory_space<vmem>>, vector<32x128xf32>
    %473 = vector.extract_strided_slice %472 {offsets = [0, 0], sizes = [32, 32], strides = [1, 1]} : vector<32x128xf32> to vector<32x32xf32>
    %cst_181 = arith.constant dense<0.000000e+00> : vector<2x32xf32>
    %474 = tpu.matmul %471, %473, %cst_181 {dimension_numbers = #tpu.dot_dimension_numbers<[1], [0], [0], [1], [0, 0, 1, 1], [], []>} : vector<2x32xf32>, vector<32x32xf32>, vector<2x32xf32> -> vector<2x32xf32>
    %cst_182 = arith.constant dense<0.000000e+00> : vector<32xf32>
    %475 = vector.multi_reduction <add>, %474, %cst_182 [0] : vector<2x32xf32> to vector<32xf32>
    %476 = vector.shape_cast %475 : vector<32xf32> to vector<1x32xf32>
    %cst_183 = arith.constant 2.000000e+00 : f32
    %477 = vector.broadcast %cst_183 : f32 to vector<1x32xf32>
    %478 = arith.divf %476, %477 : vector<1x32xf32>
    %479 = vector.broadcast %478 : vector<1x32xf32> to vector<2x32xf32>
    %480 = arith.subf %474, %479 : vector<2x32xf32>
    %481 = arith.mulf %480, %480 : vector<2x32xf32>
    %cst_184 = arith.constant dense<0.000000e+00> : vector<32xf32>
    %482 = vector.multi_reduction <add>, %481, %cst_184 [0] : vector<2x32xf32> to vector<32xf32>
    %483 = vector.shape_cast %482 : vector<32xf32> to vector<1x32xf32>
    %cst_185 = arith.constant 2.000000e+00 : f32
    %484 = vector.broadcast %cst_185 : f32 to vector<1x32xf32>
    %485 = arith.divf %483, %484 : vector<1x32xf32>
    %cst_186 = arith.constant 9.99999974E-6 : f32
    %486 = vector.broadcast %cst_186 : f32 to vector<1x32xf32>
    %487 = arith.addf %485, %486 : vector<1x32xf32>
    %488 = math.rsqrt %487 : vector<1x32xf32>
    %489 = vector.broadcast %488 : vector<1x32xf32> to vector<2x32xf32>
    %490 = arith.mulf %480, %489 : vector<2x32xf32>
    %c328 = arith.constant 328 : index
    %c0_187 = arith.constant 0 : index
    %491 = vector.load %arg1[%c328, %c0_187] : memref<1360x128xf32, #tpu.memory_space<vmem>>, vector<1x128xf32>
    %492 = vector.extract_strided_slice %491 {offsets = [0, 0], sizes = [1, 32], strides = [1, 1]} : vector<1x128xf32> to vector<1x32xf32>
    %493 = vector.broadcast %492 : vector<1x32xf32> to vector<2x32xf32>
    %494 = arith.mulf %490, %493 : vector<2x32xf32>
    %c336 = arith.constant 336 : index
    %c0_188 = arith.constant 0 : index
    %495 = vector.load %arg1[%c336, %c0_188] : memref<1360x128xf32, #tpu.memory_space<vmem>>, vector<1x128xf32>
    %496 = vector.extract_strided_slice %495 {offsets = [0, 0], sizes = [1, 32], strides = [1, 1]} : vector<1x128xf32> to vector<1x32xf32>
    %497 = vector.broadcast %496 : vector<1x32xf32> to vector<2x32xf32>
    %498 = arith.addf %494, %497 : vector<2x32xf32>
    %cst_189 = arith.constant 0.000000e+00 : f32
    %499 = vector.broadcast %cst_189 : f32 to vector<2x32xf32>
    %500 = arith.maximumf %498, %499 : vector<2x32xf32>
    %c1280 = arith.constant 1280 : index
    %c0_190 = arith.constant 0 : index
    %501 = vector.load %arg1[%c1280, %c0_190] : memref<1360x128xf32, #tpu.memory_space<vmem>>, vector<32x128xf32>
    %502 = vector.extract_strided_slice %501 {offsets = [0, 0], sizes = [32, 32], strides = [1, 1]} : vector<32x128xf32> to vector<32x32xf32>
    %cst_191 = arith.constant dense<0.000000e+00> : vector<2x32xf32>
    %503 = tpu.matmul %500, %502, %cst_191 {dimension_numbers = #tpu.dot_dimension_numbers<[1], [0], [0], [1], [0, 0, 1, 1], [], []>} : vector<2x32xf32>, vector<32x32xf32>, vector<2x32xf32> -> vector<2x32xf32>
    %c1312 = arith.constant 1312 : index
    %c0_192 = arith.constant 0 : index
    %504 = vector.load %arg1[%c1312, %c0_192] : memref<1360x128xf32, #tpu.memory_space<vmem>>, vector<1x128xf32>
    %505 = vector.extract_strided_slice %504 {offsets = [0, 0], sizes = [1, 32], strides = [1, 1]} : vector<1x128xf32> to vector<1x32xf32>
    %506 = vector.broadcast %505 : vector<1x32xf32> to vector<2x32xf32>
    %507 = arith.addf %503, %506 : vector<2x32xf32>
    %cst_193 = arith.constant 0.000000e+00 : f32
    %508 = vector.broadcast %cst_193 : f32 to vector<2x32xf32>
    %509 = arith.maximumf %507, %508 : vector<2x32xf32>
    %c1320 = arith.constant 1320 : index
    %c0_194 = arith.constant 0 : index
    %510 = vector.load %arg1[%c1320, %c0_194] : memref<1360x128xf32, #tpu.memory_space<vmem>>, vector<32x128xf32>
    %511 = vector.extract_strided_slice %510 {offsets = [0, 0], sizes = [32, 64], strides = [1, 1]} : vector<32x128xf32> to vector<32x64xf32>
    %cst_195 = arith.constant dense<0.000000e+00> : vector<2x64xf32>
    %512 = tpu.matmul %509, %511, %cst_195 {dimension_numbers = #tpu.dot_dimension_numbers<[1], [0], [0], [1], [0, 0, 1, 1], [], []>} : vector<2x32xf32>, vector<32x64xf32>, vector<2x64xf32> -> vector<2x64xf32>
    %c1352 = arith.constant 1352 : index
    %c0_196 = arith.constant 0 : index
    %513 = vector.load %arg1[%c1352, %c0_196] : memref<1360x128xf32, #tpu.memory_space<vmem>>, vector<1x128xf32>
    %514 = vector.extract_strided_slice %513 {offsets = [0, 0], sizes = [1, 64], strides = [1, 1]} : vector<1x128xf32> to vector<1x64xf32>
    %515 = vector.broadcast %514 : vector<1x64xf32> to vector<2x64xf32>
    %516 = arith.addf %512, %515 : vector<2x64xf32>
    %517 = arith.negf %516 : vector<2x64xf32>
    %518 = math.exp %517 : vector<2x64xf32>
    %cst_197 = arith.constant 1.000000e+00 : f32
    %519 = vector.broadcast %cst_197 : f32 to vector<2x64xf32>
    %520 = arith.addf %519, %518 : vector<2x64xf32>
    %521 = arith.divf %519, %520 : vector<2x64xf32>
    %cst_198 = arith.constant 0.000000e+00 : f32
    %522 = vector.broadcast %cst_198 : f32 to vector<9x2x128xf32>
    %c0_199 = arith.constant 0 : index
    %c0_200 = arith.constant 0 : index
    %c0_201 = arith.constant 0 : index
    %523 = vector.load %arg2[%c0_199, %c0_200, %c0_201] : memref<9x2x128xf32, #tpu.memory_space<vmem>>, vector<9x2x128xf32>
    tpu.vector_store %arg2[%c0_199, %c0_200, %c0_201], %522 {strides = array<i32>} : memref<9x2x128xf32, #tpu.memory_space<vmem>>, vector<9x2x128xf32>,
    %c0_202 = arith.constant 0 : index
    %c0_203 = arith.constant 0 : index
    %c0_204 = arith.constant 0 : index
    %524 = vector.load %arg2[%c0_202, %c0_203, %c0_204] : memref<9x2x128xf32, #tpu.memory_space<vmem>>, vector<1x2x64xf32>
    %525 = vector.shape_cast %524 : vector<1x2x64xf32> to vector<2x64xf32>
    %526 = vector.shape_cast %521 : vector<2x64xf32> to vector<1x2x64xf32>
    tpu.vector_store %arg2[%c0_202, %c0_203, %c0_204], %526 {strides = array<i32>} : memref<9x2x128xf32, #tpu.memory_space<vmem>>, vector<1x2x64xf32>,
    %c1 = arith.constant 1 : index
    %c0_205 = arith.constant 0 : index
    %c0_206 = arith.constant 0 : index
    %527 = vector.load %arg2[%c1, %c0_205, %c0_206] : memref<9x2x128xf32, #tpu.memory_space<vmem>>, vector<1x2x8xf32>
    %528 = vector.shape_cast %527 : vector<1x2x8xf32> to vector<2x8xf32>
    %529 = vector.shape_cast %376 : vector<2x8xf32> to vector<1x2x8xf32>
    tpu.vector_store %arg2[%c1, %c0_205, %c0_206], %529 {strides = array<i32>} : memref<9x2x128xf32, #tpu.memory_space<vmem>>, vector<1x2x8xf32>,
    %c2 = arith.constant 2 : index
    %c0_207 = arith.constant 0 : index
    %c0_208 = arith.constant 0 : index
    %530 = vector.load %arg2[%c2, %c0_207, %c0_208] : memref<9x2x128xf32, #tpu.memory_space<vmem>>, vector<1x2x16xf32>
    %531 = vector.shape_cast %530 : vector<1x2x16xf32> to vector<2x16xf32>
    %532 = vector.shape_cast %253 : vector<2x16xf32> to vector<1x2x16xf32>
    tpu.vector_store %arg2[%c2, %c0_207, %c0_208], %532 {strides = array<i32>} : memref<9x2x128xf32, #tpu.memory_space<vmem>>, vector<1x2x16xf32>,
    %c3 = arith.constant 3 : index
    %c0_209 = arith.constant 0 : index
    %c0_210 = arith.constant 0 : index
    %533 = vector.load %arg2[%c3, %c0_209, %c0_210] : memref<9x2x128xf32, #tpu.memory_space<vmem>>, vector<1x2x32xf32>
    %534 = vector.shape_cast %533 : vector<1x2x32xf32> to vector<2x32xf32>
    %535 = vector.shape_cast %130 : vector<2x32xf32> to vector<1x2x32xf32>
    tpu.vector_store %arg2[%c3, %c0_209, %c0_210], %535 {strides = array<i32>} : memref<9x2x128xf32, #tpu.memory_space<vmem>>, vector<1x2x32xf32>,
    %c4 = arith.constant 4 : index
    %c0_211 = arith.constant 0 : index
    %c0_212 = arith.constant 0 : index
    %536 = vector.load %arg2[%c4, %c0_211, %c0_212] : memref<9x2x128xf32, #tpu.memory_space<vmem>>, vector<1x2x16xf32>
    %537 = vector.shape_cast %536 : vector<1x2x16xf32> to vector<2x16xf32>
    %538 = vector.shape_cast %344 : vector<2x16xf32> to vector<1x2x16xf32>
    tpu.vector_store %arg2[%c4, %c0_211, %c0_212], %538 {strides = array<i32>} : memref<9x2x128xf32, #tpu.memory_space<vmem>>, vector<1x2x16xf32>,
    %c5 = arith.constant 5 : index
    %c0_213 = arith.constant 0 : index
    %c0_214 = arith.constant 0 : index
    %539 = vector.load %arg2[%c5, %c0_213, %c0_214] : memref<9x2x128xf32, #tpu.memory_space<vmem>>, vector<1x2x32xf32>
    %540 = vector.shape_cast %539 : vector<1x2x32xf32> to vector<2x32xf32>
    %541 = vector.shape_cast %221 : vector<2x32xf32> to vector<1x2x32xf32>
    tpu.vector_store %arg2[%c5, %c0_213, %c0_214], %541 {strides = array<i32>} : memref<9x2x128xf32, #tpu.memory_space<vmem>>, vector<1x2x32xf32>,
    %c6 = arith.constant 6 : index
    %c0_215 = arith.constant 0 : index
    %c0_216 = arith.constant 0 : index
    %542 = vector.load %arg2[%c6, %c0_215, %c0_216] : memref<9x2x128xf32, #tpu.memory_space<vmem>>, vector<1x2x64xf32>
    %543 = vector.shape_cast %542 : vector<1x2x64xf32> to vector<2x64xf32>
    %544 = vector.shape_cast %123 : vector<2x64xf32> to vector<1x2x64xf32>
    tpu.vector_store %arg2[%c6, %c0_215, %c0_216], %544 {strides = array<i32>} : memref<9x2x128xf32, #tpu.memory_space<vmem>>, vector<1x2x64xf32>,
    %c7 = arith.constant 7 : index
    %c0_217 = arith.constant 0 : index
    %c0_218 = arith.constant 0 : index
    %545 = vector.load %arg2[%c7, %c0_217, %c0_218] : memref<9x2x128xf32, #tpu.memory_space<vmem>>, vector<1x2x16xf32>
    %546 = vector.shape_cast %545 : vector<1x2x16xf32> to vector<2x16xf32>
    %547 = vector.shape_cast %371 : vector<2x16xf32> to vector<1x2x16xf32>
    tpu.vector_store %arg2[%c7, %c0_217, %c0_218], %547 {strides = array<i32>} : memref<9x2x128xf32, #tpu.memory_space<vmem>>, vector<1x2x16xf32>,
    %c8 = arith.constant 8 : index
    %c0_219 = arith.constant 0 : index
    %c0_220 = arith.constant 0 : index
    %548 = vector.load %arg2[%c8, %c0_219, %c0_220] : memref<9x2x128xf32, #tpu.memory_space<vmem>>, vector<1x2x32xf32>
    %549 = vector.shape_cast %548 : vector<1x2x32xf32> to vector<2x32xf32>
    %550 = vector.shape_cast %248 : vector<2x32xf32> to vector<1x2x32xf32>
    tpu.vector_store %arg2[%c8, %c0_219, %c0_220], %550 {strides = array<i32>} : memref<9x2x128xf32, #tpu.memory_space<vmem>>, vector<1x2x32xf32>,
    return
  }
}

</mosaic_0001>

<bundles_post_ra>
// kernel: tpu_custom_call.1
= control target key start
LH: loop header
LB: loop body
LE: loop exit
PB: predicated region body
PF: predicated region fallthrough
CT: control target
= control target key end

     0   :  { %7 = vsyncpa [#allocation3], 0  ;;  %s4520_s0 = inlined_call_operand.hbm [shape: f32[2,128], index: 0, kind: input, shape index: {}]   ;;  %s4521_s1 = inlined_call_operand.hbm [shape: f32[1360,128], index: 1, kind: input, shape index: {}]   ;;  %s4522_s2 = inlined_call_operand.hbm [shape: f32[9,2,128], index: 2, kind: output, shape index: {}]  }
   0x1   :  { %8 = vsyncpa [#allocation6], 0 }
   0x2   :  { %9 = vsyncpa [#allocation4], 0  ;;  %s4164_s9 = smov [#allocation2]   ;;  %s4165_s11 = smov [#allocation5]  }
   0x3   :  { %s16_s10 = sshll.u32 %s4164_s9, 4  ;;  %s25_s12 = sshll.u32 %s4165_s11, 4  ;;  %s17_s10 = int_to_ptr.vmem [resolvable:$true] %s16_s10  ;;  %s4193_s12 = int_to_ptr.vmem [resolvable:$true] %s25_s12 }
   0x4   :  { %s4092_s15 = scalar_lea.hbm %s4520_s0, 32 }
   0x5   :  { %p4093_p0 = scmp.ne.s32.totalorder %s4520_s0, %s4092_s15  ;;  %p4096_p1 = scmp.lt.u32.totalorder %s4092_s15, %s4520_s0 }
   0x7   :  { %p4098_p2 = pnand %p4096_p1, %p4093_p0 }
   0x9   :  { %4101 = shalt.err (!%p4098_p2)
}
   0xa   :  { %s4102_s20 = scalar_lea.vmem %s17_s10, 32  ;;  %p4107_p4 = scmp.lt.s32.totalorder %s17_s10, %s17_s10 }
   0xb   :  { %p4103_p3 = scmp.ne.s32.totalorder %s17_s10, %s4102_s20  ;;  %p4108_p5 = scmp.lt.s32.totalorder %s4102_s20, %s4102_s20 }
   0xd   :  { %p4109_p6 = por %p4108_p5, %p4107_p4 }
   0xf   :  { %p4110_p7 = pnand %p4109_p6, %p4103_p3 }
  0x11   :  { %4113 = shalt.err (!%p4110_p7)
}
  0x12   :  { %19 = dma.hbm_to_vmem [thread:$0]  %s4520_s0, 32, %s17_s10, [#allocation3]  }
  0x13   :  { %s4114_s25 = scalar_lea.hbm %s4521_s1, 21760 }
  0x14   :  { %p4115_p8 = scmp.ne.s32.totalorder %s4521_s1, %s4114_s25  ;;  %p4118_p9 = scmp.lt.u32.totalorder %s4114_s25, %s4521_s1 }
  0x16   :  { %p4120_p10 = pnand %p4118_p9, %p4115_p8 }
  0x18   :  { %4123 = shalt.err (!%p4120_p10)
}
  0x19   :  { %s4124_s30 = scalar_lea.vmem %s4193_s12, 21760  ;;  %p4129_p12 = scmp.lt.s32.totalorder %s4193_s12, %s4193_s12 }
  0x1a   :  { %p4125_p11 = scmp.ne.s32.totalorder %s4193_s12, %s4124_s30  ;;  %p4130_p13 = scmp.lt.s32.totalorder %s4124_s30, %s4124_s30 }
  0x1c   :  { %p4131_p0 = por %p4130_p13, %p4129_p12 }
  0x1e   :  { %p4132_p1 = pnand %p4131_p0, %p4125_p11 }
  0x20   :  { %4135 = shalt.err (!%p4132_p1)
}
  0x21   :  { %s4166_s0 = smov 128   ;;  %s4167_s3 = smov 8  }
  0x22   :  { %31 = dma.hbm_to_vmem [thread:$0]  %s4521_s1, 21760, %s4193_s12, [#allocation6], %s4166_s0, %s4166_s0, %s4167_s3  }
  0x23   :  { %4158 = dma.done.wait [#allocation3], 32  }
  0x24   :  { %4159 = vsyncadd [#allocation3], 4294967264 }
  0x25   :  { %4160 = dma.done.wait [#allocation6], 21760  }
  0x26   :  { %4161 = vsyncadd [#allocation6], 4294945536  ;;  %v4168_v0 = vmov 0.0|0.0   ;;  %vm4169_vm0 = vmmov 0   ;;  %v4170_v1 = vmov 0.0   ;;  %v39_v2 = vld [vmem:[#allocation5] sm:$0xff] }
  0x27   :  { %3828 = vmatprep.subr.bf16.mxu0 %v4168_v0  ;;  %3456 = vmatprep.mubr.msk.f32.mxu0 %vm4169_vm0, %v4170_v1  ;;  %3146 = vst [vmem:[#allocation7] sm:$0x3] %v4170_v1  ;;  %3147 = vst [vmem:[#allocation7 + $0x2] sm:$0x3] %v4170_v1  ;;  %v40_v3 = vld [vmem:[#allocation5 + $0x8] sm:$0xff]  ;;  %v41_v4 = vld [vmem:[#allocation5 + $0x10] sm:$0xff] }
  0x28   :  { %3148 = vst [vmem:[#allocation7 + $0x4] sm:$0x3] %v4170_v1  ;;  %3149 = vst [vmem:[#allocation7 + $0x6] sm:$0x3] %v4170_v1  ;;  %3840 = vmatprep.subr.bf16.mxu1 %v4168_v0  ;;  %3467 = vmatprep.mubr.msk.f32.mxu1 %vm4169_vm0, %v4170_v1  ;;  %v3829_v5 = vpack.c.bf16 %v40_v3, %v39_v2  ;;  %v42_v6 = vld [vmem:[#allocation5 + $0x18] sm:$0xff]  ;;  %v43_v8 = vld [vmem:[#allocation5 + $0x20] sm:$0xff] }
  0x29   :  { %3150 = vst [vmem:[#allocation7 + $0x8] sm:$0x3] %v4170_v1  ;;  %3151 = vst [vmem:[#allocation7 + $0xa] sm:$0x3] %v4170_v1  ;;  %v3832_v7 = vpack.c.bf16 %v42_v6, %v41_v4  ;;  %v44_v9 = vld [vmem:[#allocation5 + $0x28] sm:$0xff]  ;;  %v45_v11 = vld [vmem:[#allocation5 + $0x30] sm:$0xff] }
  0x2a   :  { %3152 = vst [vmem:[#allocation7 + $0xc] sm:$0x3] %v4170_v1  ;;  %3153 = vst [vmem:[#allocation7 + $0xe] sm:$0x3] %v4170_v1  ;;  %3830 = vmatpush3.bf16.msra.mxu0 %v3829_v5  ;;  %v3835_v10 = vpack.c.bf16 %v44_v9, %v43_v8  ;;  %v46_v12 = vld [vmem:[#allocation5 + $0x38] sm:$0xff]  ;;  %vm47_vm1 = vcmask 523264  }
  0x2b   :  { %3154 = vst [vmem:[#allocation7 + $0x10] sm:$0x3] %v4170_v1  ;;  %3831 = vmatprep.subr.bf16.mxu0 %v4168_v0  ;;  %v3838_v13 = vpack.c.bf16 %v46_v12, %v45_v11  ;;  %v4242_v14 = vld [vmem:[#allocation2] sm:$0x3]  ;;  %v157_v15 = vld [vmem:[#allocation5 + $0x50] sm:$0xff]  ;;  %v159_v18 = vld [vmem:[#allocation5 + $0x60] sm:$0xff] }
  0x2c   :  { %v158_v16 = vld [vmem:[#allocation5 + $0x58] sm:$0xff]  ;;  %v160_v19 = vld [vmem:[#allocation5 + $0x68] sm:$0xff]  ;;  %vm121_vm2 = vcmask 254976   ;;  %v3194_v43 = vld [vmem:[#allocation5 + $0x40] ss:$0 sm:$0xff]  ;;  %vm161_vm3 = vcmask 261120  }
  0x2d   :  { %v3841_v17 = vpack.c.bf16 %v158_v16, %v157_v15  ;;  %v3844_v20 = vpack.c.bf16 %v160_v19, %v159_v18  ;;  %v3195_v45 = vld [vmem:[#allocation5 + $0x48] ss:$0 sm:$0xff]  ;;  %v270_v49 = vld [vmem:[#allocation5 + $0x80] sm:$0xff]  ;;  %v272_v52 = vld [vmem:[#allocation5 + $0x90] sm:$0xff]  ;;  %vm235_vm4 = vcmask 779264   ;;  %vm282_vm5 = vcmask 785408  }
  0x2e   :  { %3833 = vmatpush3.bf16.msra.mxu0 %v3832_v7  ;;  %v271_v50 = vld [vmem:[#allocation5 + $0x88] sm:$0xff]  ;;  %v273_v53 = vld [vmem:[#allocation5 + $0x98] sm:$0xff]  ;;  %v274_v55 = vld [vmem:[#allocation5 + $0xa0] sm:$0xff]  ;;  %s4171_s1 = smov 64   ;;  %vm3155_vm6 = vcmask 517120   ;;  %s4172_s6 = smov 56  }
  0x2f   :  { %3834 = vmatprep.subr.bf16.mxu0 %v4168_v0  ;;  %3842 = vmatpush3.bf16.msra.mxu1 %v3841_v17  ;;  %v3847_v51 = vpack.c.bf16 %v271_v50, %v270_v49  ;;  %v3850_v54 = vpack.c.bf16 %v273_v53, %v272_v52  ;;  %v275_v56 = vld [vmem:[#allocation5 + $0xa8] sm:$0xff]  ;;  %v276_v58 = vld [vmem:[#allocation5 + $0xb0] sm:$0xff]  ;;  %v277_v59 = vld [vmem:[#allocation5 + $0xb8] sm:$0xff]  ;;  %s4173_s7 = smov 40   ;;  %s4174_s8 = smov 96   ;;  %vm3161_vm7 = vcmask 123904  }
  0x30   :  { %3843 = vmatprep.subr.bf16.mxu1 %v4168_v0  ;;  %v3853_v57 = vpack.c.bf16 %v275_v56, %v274_v55  ;;  %v3856_v60 = vpack.c.bf16 %v277_v59, %v276_v58  ;;  %v278_v61 = vld [vmem:[#allocation5 + $0xc0] sm:$0xff]  ;;  %v279_v62 = vld [vmem:[#allocation5 + $0xc8] sm:$0xff]  ;;  %v280_v2 = vld [vmem:[#allocation5 + $0xd0] sm:$0xff]  ;;  %vm1615_vm8 = vcmask 130048   ;;  %vm3158_vm9 = vcmask 58368   ;;  %s4175_s9 = smov [#allocation7]  }
  0x31   :  { %v3859_v63 = vpack.c.bf16 %v279_v62, %v278_v61  ;;  %v281_v3 = vld [vmem:[#allocation5 + $0xd8] sm:$0xff]  ;;  %v3200_v62 = vld [vmem:[#allocation5 + $0xe0] ss:$0 sm:$0xff]  ;;  %vm2683_vm10 = vcmask 64512   ;;  %s3180_s10 = sshll.u32 %s4175_s9, 4  ;;  %s3181_s10 = int_to_ptr.vmem [resolvable:$true] %s3180_s10 }
  0x32   :  { %3836 = vmatpush3.bf16.msra.mxu0 %v3835_v10  ;;  %v3862_v4 = vpack.c.bf16 %v281_v3, %v280_v2  ;;  %v3201_v2 = vld [vmem:[#allocation5 + $0xe8] ss:$0 sm:$0xff]  ;;  %s4136_s11 = scalar_lea.vmem %s3181_s10, 288  ;;  %p4141_p3 = scmp.lt.s32.totalorder %s3181_s10, %s3181_s10 }
  0x33   :  { %3837 = vmatprep.subr.bf16.mxu0 %v4168_v0  ;;  %3845 = vmatpush3.bf16.msra.mxu1 %v3844_v20  ;;  %p4137_p2 = scmp.ne.s32.totalorder %s3181_s10, %s4136_s11  ;;  %p4142_p4 = scmp.lt.s32.totalorder %s4136_s11, %s4136_s11 }
  0x34   :  { %3846 = vmatprep.subr.bf16.mxu1 %v4168_v0 }
  0x35   :  { %p4143_p5 = por %p4142_p4, %p4141_p3 }
  0x36   :  { %3839 = vmatpush3.bf16.msra.mxu0 %v3838_v13 }
  0x37   :  { %3864 = vmatprep.subr.bf16.mxu0 %v4168_v0  ;;  %p4144_p6 = pnand %p4143_p5, %p4137_p2 }
  0x39   :  { %3457 = vmatmul.mubr.msk.f32.vlgmr.msra.gmra.mrb[0].mxu0 %vm47_vm1, %v4242_v14 }
  0x3a   :  { %3505 = vmatprep.mubr.msk.f32.mxu0 %vm4169_vm0, %v4170_v1 }
 0x10c   :  { %v117_v21 = vpop.f32.mrb[0].mxu0 }
 0x10d   :  { %v122_v22 = vsel %vm121_vm2, %v117_v21, 0.0  ;;  %v3458_v23 = vpop.f32.mrb[1].mxu0 }
 0x10e   :  { %v123_v24 = vrot.slane %v122_v22, 4 }
 0x110   :  { %v124_v25 = vadd.f32 %v123_v24, %v122_v22 }
 0x112   :  { %v125_v26 = vrot.slane %v124_v25, 2 }
 0x114   :  { %v126_v27 = vadd.f32 %v125_v26, %v124_v25 }
 0x116   :  { %v127_v28 = vrot.slane %v126_v27, 1 }
 0x118   :  { %v128_v29 = vadd.f32 %v127_v28, %v126_v27  ;;  %v3197_v28 = vld [vmem:[#allocation5 + $0x70] ss:$0 sm:$0xff] }
 0x11a   :  { %v130_v30 = vmul.f32 0.5, %v128_v29 }
 0x11c   :  { %v131_v31 = vsub.f32 %v117_v21, %v130_v30  ;;  %v3198_v30 = vld [vmem:[#allocation5 + $0x78] ss:$0 sm:$0xff] }
 0x11e   :  { %v132_v32 = vmul.f32 %v131_v31, %v131_v31 }
 0x120   :  { %v133_v33 = vsel %vm121_vm2, %v132_v32, 0.0 }
 0x121   :  { %v134_v34 = vrot.slane %v133_v33, 4 }
 0x123   :  { %v135_v35 = vadd.f32 %v134_v34, %v133_v33  ;;  %v394_v34 = vld [vmem:[#allocation5 + $0x488] sm:$0xff] }
 0x125   :  { %v136_v36 = vrot.slane %v135_v35, 2 }
 0x127   :  { %v137_v37 = vadd.f32 %v136_v36, %v135_v35  ;;  %v395_v35 = vld [vmem:[#allocation5 + $0x490] sm:$0xff]  ;;  %v396_v36 = vld [vmem:[#allocation5 + $0x498] sm:$0xff] }
 0x129   :  { %v138_v38 = vrot.slane %v137_v37, 1 }
 0x12b   :  { %v139_v39 = vadd.f32 %v138_v38, %v137_v37  ;;  %v3865_v37 = vpack.c.bf16 %v395_v35, %v394_v34  ;;  %v397_v38 = vld [vmem:[#allocation5 + $0x4a0] sm:$0xff]  ;;  %v3205_v34 = vld [vmem:[#allocation5 + $0x4d0] ss:$0 sm:$0xff] }
 0x12d   :  { %v140_v40 = vmul.f32 0.5, %v139_v39  ;;  %3866 = vmatpush3.bf16.msra.mxu0 %v3865_v37  ;;  %v3868_v39 = vpack.c.bf16 %v397_v38, %v396_v36 }
 0x12e   :  { %3867 = vmatprep.subr.bf16.mxu0 %v4168_v0 }
 0x12f   :  { %v141_v41 = vadd.f32 1e-05, %v140_v40 }
 0x131   :  { %4059 = vrsqrt.f32 %v141_v41  ;;  %3869 = vmatpush3.bf16.msra.mxu0 %v3868_v39  ;;  %v3207_v39 = vld [vmem:[#allocation5 + $0x4f8] ss:$0 sm:$0xff] }
 0x132   :  { %3870 = vmatprep.subr.bf16.mxu0 %v4168_v0 }
 0x13b   :  { %v4060_v42 = vpop.eup %4059 }
 0x13c   :  { %v143_v44 = vmul.f32 %v4060_v42, %v131_v31 }
 0x13e   :  { %v149_v46 = vmul.f32 %v3194_v43, %v143_v44 }
 0x140   :  { %v155_v47 = vadd.f32 %v3195_v45, %v149_v46 }
 0x142   :  { %v156_v48 = vmax.f32 %v155_v47, 0.0 }
 0x144   :  { %3468 = vmatmul.mubr.msk.f32.vlgmr.msra.gmra.mrb[0].mxu1 %vm161_vm3, %v156_v48 }
 0x145   :  { %3494 = vmatprep.mubr.msk.f32.mxu1 %vm4169_vm0, %v4170_v1  ;;  %3848 = vmatpush3.bf16.msra.mxu1 %v3847_v51 }
 0x146   :  { %3849 = vmatprep.subr.bf16.mxu1 %v4168_v0 }
 0x149   :  { %3851 = vmatpush3.bf16.msra.mxu1 %v3850_v54 }
 0x14a   :  { %3852 = vmatprep.subr.bf16.mxu1 %v4168_v0 }
 0x14d   :  { %3854 = vmatpush3.bf16.msra.mxu1 %v3853_v57 }
 0x14e   :  { %3855 = vmatprep.subr.bf16.mxu1 %v4168_v0 }
 0x151   :  { %3857 = vmatpush3.bf16.msra.mxu1 %v3856_v60 }
 0x152   :  { %3858 = vmatprep.subr.bf16.mxu1 %v4168_v0 }
 0x155   :  { %3860 = vmatpush3.bf16.msra.mxu1 %v3859_v63 }
 0x156   :  { %3861 = vmatprep.subr.bf16.mxu1 %v4168_v0 }
 0x159   :  { %3863 = vmatpush3.bf16.msra.mxu1 %v3862_v4 }
 0x15a   :  { %3882 = vmatprep.subr.bf16.mxu1 %v4168_v0 }
 0x217   :  { %v231_v5 = vpop.f32.mrb[0].mxu1 }
 0x218   :  { %v236_v6 = vsel %vm235_vm4, %v231_v5, 0.0  ;;  %v3469_v7 = vpop.f32.mrb[1].mxu1 }
 0x219   :  { %v237_v8 = vrot.slane %v236_v6, 4  ;;  %v391_v7 = vld [vmem:[#allocation5 + $0x470] sm:$0xff] }
 0x21b   :  { %v238_v9 = vadd.f32 %v237_v8, %v236_v6  ;;  %v390_v6 = vld [vmem:[#allocation5 + $0x468] sm:$0xff] }
 0x21c   :  { %v3871_v8 = vpack.c.bf16 %v391_v7, %v390_v6 }
 0x21d   :  { %v239_v10 = vrot.slane %v238_v9, 2 }
 0x21f   :  { %v240_v11 = vadd.f32 %v239_v10, %v238_v9  ;;  %v392_v9 = vld [vmem:[#allocation5 + $0x478] sm:$0xff]  ;;  %v393_v10 = vld [vmem:[#allocation5 + $0x480] sm:$0xff] }
 0x221   :  { %v241_v12 = vrot.slane %v240_v11, 1 }
 0x223   :  { %v242_v13 = vadd.f32 %v241_v12, %v240_v11  ;;  %v3874_v12 = vpack.c.bf16 %v393_v10, %v392_v9  ;;  %v914_v9 = vld [vmem:[#allocation5 + $0x440] sm:$0xff] }
 0x225   :  { %v243_v15 = vmul.f32 0.5, %v242_v13  ;;  %v550_v13 = vld [vmem:[#allocation5 + $0x4b0] sm:$0xff] }
 0x227   :  { %v244_v16 = vsub.f32 %v231_v5, %v243_v15  ;;  %v551_v15 = vld [vmem:[#allocation5 + $0x4b8] sm:$0xff] }
 0x229   :  { %v245_v17 = vmul.f32 %v244_v16, %v244_v16 }
 0x22b   :  { %v246_v18 = vsel %vm235_vm4, %v245_v17, 0.0  ;;  %v552_v17 = vld [vmem:[#allocation5 + $0x4c0] sm:$0xff] }
 0x22c   :  { %v247_v19 = vrot.slane %v246_v18, 4 }
 0x22e   :  { %v248_v20 = vadd.f32 %v247_v19, %v246_v18  ;;  %v553_v18 = vld [vmem:[#allocation5 + $0x4c8] sm:$0xff] }
 0x22f   :  { %v3880_v19 = vpack.c.bf16 %v553_v18, %v552_v17 }
 0x230   :  { %v249_v21 = vrot.slane %v248_v20, 2 }
 0x232   :  { %v250_v22 = vadd.f32 %v249_v21, %v248_v20  ;;  %v633_v20 = vld [vmem:[#allocation5 + $0x4d8] sm:$0xff]  ;;  %v634_v21 = vld [vmem:[#allocation5 + $0x4e0] sm:$0xff] }
 0x234   :  { %v251_v23 = vrot.slane %v250_v22, 1 }
 0x236   :  { %v252_v24 = vadd.f32 %v251_v23, %v250_v22  ;;  %v3883_v22 = vpack.c.bf16 %v634_v21, %v633_v20 }
 0x238   :  { %v253_v25 = vmul.f32 0.5, %v252_v24 }
 0x23a   :  { %v254_v26 = vadd.f32 1e-05, %v253_v25 }
 0x23c   :  { %4061 = vrsqrt.f32 %v254_v26  ;;  %v3204_v26 = vld [vmem:[#allocation5 + $0x4a8] ss:$0 sm:$0xff] }
 0x246   :  { %v4062_v27 = vpop.eup %4061 }
 0x247   :  { %v256_v29 = vmul.f32 %v4062_v27, %v244_v16  ;;  %v3877_v16 = vpack.c.bf16 %v551_v15, %v550_v13 }
 0x249   :  { %v262_v31 = vmul.f32 %v3197_v28, %v256_v29 }
 0x24b   :  { %v268_v32 = vadd.f32 %v3198_v30, %v262_v31  ;;  %v635_v31 = vld [vmem:[#allocation5 + $0x4e8] sm:$0xff] }
 0x24d   :  { %v269_v33 = vmax.f32 %v268_v32, 0.0  ;;  %v636_v32 = vld [vmem:[#allocation5 + $0x4f0] sm:$0xff] }
 0x24f   :  { %3495 = vmatmul.mubr.msk.f32.vlgmr.msra.gmra.mrb[2].mxu1 %vm282_vm5, %v269_v33  ;;  %v3886_v33 = vpack.c.bf16 %v636_v32, %v635_v31 }
 0x250   :  { %3538 = vmatprep.mubr.msk.f32.mxu1 %vm4169_vm0, %v4170_v1  ;;  %3884 = vmatpush3.bf16.msra.mxu1 %v3883_v22 }
 0x251   :  { %3885 = vmatprep.subr.bf16.mxu1 %v4168_v0 }
 0x254   :  { %3887 = vmatpush3.bf16.msra.mxu1 %v3886_v33 }
 0x255   :  { %3900 = vmatprep.subr.bf16.mxu1 %v4168_v0 }
 0x322   :  { %v352_v40 = vpop.f32.mrb[2].mxu1 }
 0x323   :  { %v356_v41 = vsel %vm235_vm4, %v352_v40, 0.0  ;;  %v3496_v42 = vpop.f32.mrb[3].mxu1 }
 0x324   :  { %v357_v43 = vrot.slane %v356_v41, 4 }
 0x326   :  { %v358_v44 = vadd.f32 %v357_v43, %v356_v41 }
 0x328   :  { %v359_v45 = vrot.slane %v358_v44, 2 }
 0x32a   :  { %v360_v46 = vadd.f32 %v359_v45, %v358_v44  ;;  %v732_v45 = vld [vmem:[#allocation5 + $0x408] sm:$0xff] }
 0x32c   :  { %v361_v47 = vrot.slane %v360_v46, 1 }
 0x32e   :  { %v362_v48 = vadd.f32 %v361_v47, %v360_v46  ;;  %v733_v46 = vld [vmem:[#allocation5 + $0x410] sm:$0xff]  ;;  %v734_v47 = vld [vmem:[#allocation5 + $0x418] sm:$0xff] }
 0x330   :  { %v363_v49 = vmul.f32 0.5, %v362_v48  ;;  %v3889_v48 = vpack.c.bf16 %v733_v46, %v732_v45  ;;  %v1028_v45 = vld [vmem:[#allocation5 + $0x2f8] sm:$0xff]  ;;  %v1029_v46 = vld [vmem:[#allocation5 + $0x300] sm:$0xff] }
 0x332   :  { %v364_v50 = vsub.f32 %v352_v40, %v363_v49  ;;  %v735_v49 = vld [vmem:[#allocation5 + $0x420] sm:$0xff] }
 0x334   :  { %v365_v51 = vmul.f32 %v364_v50, %v364_v50 }
 0x336   :  { %v366_v52 = vsel %vm235_vm4, %v365_v51, 0.0 }
 0x337   :  { %v367_v53 = vrot.slane %v366_v52, 4 }
 0x339   :  { %v368_v54 = vadd.f32 %v367_v53, %v366_v52 }
 0x33b   :  { %v369_v55 = vrot.slane %v368_v54, 2 }
 0x33d   :  { %v370_v56 = vadd.f32 %v369_v55, %v368_v54  ;;  %v728_v54 = vld [vmem:[#allocation5 + $0x3e8] sm:$0xff]  ;;  %v729_v55 = vld [vmem:[#allocation5 + $0x3f0] sm:$0xff] }
 0x33f   :  { %v371_v57 = vrot.slane %v370_v56, 1 }
 0x341   :  { %v372_v58 = vadd.f32 %v371_v57, %v370_v56  ;;  %v3895_v57 = vpack.c.bf16 %v729_v55, %v728_v54 }
 0x343   :  { %v373_v59 = vmul.f32 0.5, %v372_v58 }
 0x345   :  { %v374_v60 = vadd.f32 1e-05, %v373_v59  ;;  %v730_v59 = vld [vmem:[#allocation5 + $0x3f8] sm:$0xff] }
 0x347   :  { %4063 = vrsqrt.f32 %v374_v60  ;;  %v731_v60 = vld [vmem:[#allocation5 + $0x400] sm:$0xff] }
 0x351   :  { %v4064_v61 = vpop.eup %4063 }
 0x352   :  { %v376_v63 = vmul.f32 %v4064_v61, %v364_v50  ;;  %v3892_v50 = vpack.c.bf16 %v735_v49, %v734_v47  ;;  %v3898_v61 = vpack.c.bf16 %v731_v60, %v730_v59  ;;  %v3907_v47 = vpack.c.bf16 %v1029_v46, %v1028_v45  ;;  %v1031_v49 = vld [vmem:[#allocation5 + $0x310] sm:$0xff]  ;;  %v1431_v45 = vld [vmem:[#allocation5 + $0x398] sm:$0xff]  ;;  %v1432_v46 = vld [vmem:[#allocation5 + $0x3a0] sm:$0xff] }
 0x354   :  { %v382_v3 = vmul.f32 %v3200_v62, %v376_v63  ;;  %v1024_v62 = vld [vmem:[#allocation5 + $0x2d8] sm:$0xff]  ;;  %v1025_v63 = vld [vmem:[#allocation5 + $0x2e0] sm:$0xff] }
 0x356   :  { %v388_v4 = vadd.f32 %v3201_v2, %v382_v3  ;;  %v3913_v2 = vpack.c.bf16 %v1025_v63, %v1024_v62  ;;  %v1026_v3 = vld [vmem:[#allocation5 + $0x2e8] sm:$0xff] }
 0x358   :  { %v4269_v5 = vmax.f32 %v388_v4, 0.0  ;;  %v1027_v4 = vld [vmem:[#allocation5 + $0x2f0] sm:$0xff] }
 0x359   :  { %v3916_v6 = vpack.c.bf16 %v1027_v4, %v1026_v3 }
 0x35a   :  { %399 = vrot.lane.b32.xlu0 %v4269_v5, %s4171_s1 }
 0x3cc   :  { %v4273_v11 = vpop.permute.xlu0 %399 }
 0x3cd   :  { %3506 = vmatmul.mubr.msk.f32.vlgmr.msra.gmra.mrb[2].mxu0 %vm161_vm3, %v4273_v11 }
 0x3ce   :  { %3872 = vmatpush3.bf16.msra.mxu0 %v3871_v8  ;;  %3516 = vmatprep.mubr.msk.f32.mxu0 %vm4169_vm0, %v4170_v1  ;;  %v913_v8 = vld [vmem:[#allocation5 + $0x438] sm:$0xff] }
 0x3cf   :  { %3873 = vmatprep.subr.bf16.mxu0 %v4168_v0  ;;  %v3901_v10 = vpack.c.bf16 %v914_v9, %v913_v8 }
 0x3d2   :  { %3875 = vmatpush3.bf16.msra.mxu0 %v3874_v12  ;;  %v916_v12 = vld [vmem:[#allocation5 + $0x450] sm:$0xff] }
 0x3d3   :  { %3876 = vmatprep.subr.bf16.mxu0 %v4168_v0 }
 0x3d5   :  { %3517 = vmatmul.mubr.msk.f32.vlgmr.msra.gmra.mrb[4].mxu0 %vm161_vm3, %v4273_v11 }
 0x3d6   :  { %3527 = vmatprep.mubr.msk.f32.mxu0 %vm4169_vm0, %v4170_v1  ;;  %3878 = vmatpush3.bf16.msra.mxu0 %v3877_v16 }
 0x3d7   :  { %3879 = vmatprep.subr.bf16.mxu0 %v4168_v0 }
 0x3da   :  { %3881 = vmatpush3.bf16.msra.mxu0 %v3880_v19 }
 0x3db   :  { %3888 = vmatprep.subr.bf16.mxu0 %v4168_v0 }
 0x4a0   :  { %v469_v23 = vpop.f32.mrb[2].mxu0 }
 0x4a1   :  { %v3507_v24 = vpop.f32.mrb[3].mxu0 }
 0x4a8   :  { %v539_v25 = vpop.f32.mrb[4].mxu0 }
 0x4a9   :  { %v540_v27 = vadd.f32 %v539_v25, %v469_v23  ;;  %v3518_v28 = vpop.f32.mrb[5].mxu0 }
 0x4ab   :  { %v548_v29 = vadd.f32 %v3204_v26, %v540_v27 }
 0x4ad   :  { %v549_v30 = vmax.f32 %v548_v29, 0.0 }
 0x4af   :  { %3528 = vmatmul.mubr.msk.f32.vlgmr.msra.gmra.mrb[6].mxu0 %vm161_vm3, %v549_v30 }
 0x4b0   :  { %3549 = vmatprep.mubr.msk.f32.mxu0 %vm4169_vm0, %v4170_v1  ;;  %3890 = vmatpush3.bf16.msra.mxu0 %v3889_v48  ;;  %v1030_v48 = vld [vmem:[#allocation5 + $0x308] sm:$0xff] }
 0x4b1   :  { %3891 = vmatprep.subr.bf16.mxu0 %v4168_v0 }
 0x4b4   :  { %3893 = vmatpush3.bf16.msra.mxu0 %v3892_v50  ;;  %v3910_v50 = vpack.c.bf16 %v1031_v49, %v1030_v48 }
 0x4b5   :  { %3894 = vmatprep.subr.bf16.mxu0 %v4168_v0 }
 0x582   :  { %v628_v35 = vpop.f32.mrb[6].mxu0 }
 0x583   :  { %v629_v36 = vadd.f32 %v3205_v34, %v628_v35  ;;  %v3529_v37 = vpop.f32.mrb[7].mxu0 }
 0x585   :  { %v632_v38 = vmax.f32 %v629_v36, 0.0 }
 0x587   :  { %3539 = vmatmul.mubr.msk.f32.vlgmr.msra.gmra.mrb[4].mxu1 %vm161_vm3, %v632_v38 }
 0x588   :  { %3571 = vmatprep.mubr.msk.f32.mxu1 %vm4169_vm0, %v4170_v1  ;;  %3902 = vmatpush3.bf16.msra.mxu1 %v3901_v10 }
 0x589   :  { %3903 = vmatprep.subr.bf16.mxu1 %v4168_v0 }
 0x65a   :  { %v711_v40 = vpop.f32.mrb[4].mxu1 }
 0x65b   :  { %v712_v41 = vadd.f32 %v3207_v39, %v711_v40  ;;  %v3540_v42 = vpop.f32.mrb[5].mxu1  ;;  %v3211_v39 = vld [vmem:[#allocation5 + $0x428] ss:$0 sm:$0xff] }
 0x65d   :  { %v715_v43 = vmul.f32 0.5, %v712_v41  ;;  %3170 = vst.msk [vmem:[#allocation7 + $0xc] sm:$0x3] %vm3155_vm6, %v712_v41 }
 0x65f   :  { %v716_v44 = vmul.f32 1.442695, %v715_v43 }
 0x661   :  { %4065 = vpow2.f32 %v716_v44 }
 0x66b   :  { %v4066_v51 = vpop.eup %4065 }
 0x66c   :  { %719 = vrot.lane.b32.xlu0 %v4066_v51, %s4172_s6 }
 0x6de   :  { %v720_v52 = vpop.permute.xlu0 %719 }
 0x6df   :  { %v722_v53 = vmul.f32 %v720_v52, %v4242_v14 }
 0x6e1   :  { %724 = vrot.lane.b32.xlu1 %v722_v53, %s4173_s7 }
 0x6e5   :  { %1105 = vrot.lane.b32.xlu1 %v4269_v5, %s4174_s8 }
 0x753   :  { %v725_v56 = vpop.permute.xlu1 %724 }
 0x754   :  { %v4301_v58 = vadd.f32 %v725_v56, %v712_v41  ;;  %v3212_v41 = vld [vmem:[#allocation5 + $0x430] ss:$0 sm:$0xff] }
 0x756   :  { %3164 = vst.msk [vmem:[#allocation7 + $0x6] sm:$0x3] %vm121_vm2, %v4301_v58  ;;  %3550 = vmatmul.mubr.msk.f32.vlgmr.msra.gmra.mrb[8].mxu0 %vm161_vm3, %v4301_v58 }
 0x757   :  { %3896 = vmatpush3.bf16.msra.mxu0 %v3895_v57  ;;  %3560 = vmatprep.mubr.msk.f32.mxu0 %vm4169_vm0, %v4170_v1  ;;  %v1106_v7 = vpop.permute.xlu1 %1105 }
 0x758   :  { %3897 = vmatprep.subr.bf16.mxu0 %v4168_v0 }
 0x75b   :  { %3899 = vmatpush3.bf16.msra.mxu0 %v3898_v61 }
 0x75c   :  { %3912 = vmatprep.subr.bf16.mxu0 %v4168_v0 }
 0x75e   :  { %3561 = vmatmul.mubr.msk.f32.vlgmr.msra.gmra.mrb[8].mxu0 %vm161_vm3, %v4273_v11  ;;  %v915_v11 = vld [vmem:[#allocation5 + $0x448] sm:$0xff] }
 0x75f   :  { %3914 = vmatpush3.bf16.msra.mxu0 %v3913_v2  ;;  %3593 = vmatprep.mubr.msk.f32.mxu0 %vm4169_vm0, %v4170_v1  ;;  %v3904_v13 = vpack.c.bf16 %v916_v12, %v915_v11 }
 0x760   :  { %3915 = vmatprep.subr.bf16.mxu0 %v4168_v0 }
 0x761   :  { %3905 = vmatpush3.bf16.msra.mxu1 %v3904_v13  ;;  %v3214_v13 = vld [vmem:[#allocation5 + $0x458] ss:$0 sm:$0xff] }
 0x762   :  { %3906 = vmatprep.subr.bf16.mxu1 %v4168_v0 }
 0x763   :  { %3917 = vmatpush3.bf16.msra.mxu0 %v3916_v6 }
 0x764   :  { %3924 = vmatprep.subr.bf16.mxu0 %v4168_v0 }
 0x766   :  { %3594 = vmatmul.mubr.msk.f32.vlgmr.msra.gmra.mrb[10].mxu0 %vm161_vm3, %v1106_v7 }
 0x767   :  { %3615 = vmatprep.mubr.msk.f32.mxu0 %vm4169_vm0, %v4170_v1 }
 0x831   :  { %v875_v15 = vpop.f32.mrb[8].mxu0 }
 0x832   :  { %v879_v16 = vsel %vm121_vm2, %v875_v15, 0.0  ;;  %v3562_v17 = vpop.f32.mrb[9].mxu0 }
 0x833   :  { %v880_v18 = vrot.slane %v879_v16, 4 }
 0x835   :  { %v881_v19 = vadd.f32 %v880_v18, %v879_v16  ;;  %v3215_v16 = vld [vmem:[#allocation5 + $0x460] ss:$0 sm:$0xff] }
 0x836   :  { %v1186_v18 = vld [vmem:[#allocation5 + $0x320] sm:$0xff] }
 0x837   :  { %v882_v20 = vrot.slane %v881_v19, 2 }
 0x839   :  { %v883_v21 = vadd.f32 %v882_v20, %v881_v19  ;;  %v4323_v22 = vpop.f32.mrb[10].mxu0  ;;  %v1187_v19 = vld [vmem:[#allocation5 + $0x328] sm:$0xff] }
 0x83a   :  { %v3595_v23 = vpop.f32.mrb[11].mxu0 }
 0x83b   :  { %v884_v24 = vrot.slane %v883_v21, 1 }
 0x83d   :  { %v885_v25 = vadd.f32 %v884_v24, %v883_v21  ;;  %v3919_v21 = vpack.c.bf16 %v1187_v19, %v1186_v18  ;;  %v1188_v24 = vld [vmem:[#allocation5 + $0x330] sm:$0xff] }
 0x83f   :  { %v886_v26 = vmul.f32 0.5, %v885_v25  ;;  %v1189_v25 = vld [vmem:[#allocation5 + $0x338] sm:$0xff] }
 0x841   :  { %v887_v27 = vsub.f32 %v875_v15, %v886_v26  ;;  %v3922_v26 = vpack.c.bf16 %v1189_v25, %v1188_v24  ;;  %v1612_v24 = vld [vmem:[#allocation5 + $0x280] sm:$0xff] }
 0x843   :  { %v888_v28 = vmul.f32 %v887_v27, %v887_v27 }
 0x845   :  { %v889_v29 = vsel %vm121_vm2, %v888_v28, 0.0  ;;  %v1270_v28 = vld [vmem:[#allocation5 + $0x350] sm:$0xff] }
 0x846   :  { %v890_v30 = vrot.slane %v889_v29, 4 }
 0x848   :  { %v891_v31 = vadd.f32 %v890_v30, %v889_v29 }
 0x84a   :  { %v892_v32 = vrot.slane %v891_v31, 2 }
 0x84c   :  { %v893_v33 = vadd.f32 %v892_v32, %v891_v31  ;;  %v3218_v31 = vld [vmem:[#allocation5 + $0x318] ss:$0 sm:$0xff] }
 0x84e   :  { %v894_v34 = vrot.slane %v893_v33, 1 }
 0x850   :  { %v895_v35 = vadd.f32 %v894_v34, %v893_v33  ;;  %v1351_v34 = vld [vmem:[#allocation5 + $0x370] sm:$0xff] }
 0x852   :  { %v896_v36 = vmul.f32 0.5, %v895_v35  ;;  %v1352_v35 = vld [vmem:[#allocation5 + $0x378] sm:$0xff] }
 0x854   :  { %v897_v37 = vadd.f32 1e-05, %v896_v36 }
 0x856   :  { %4067 = vrsqrt.f32 %v897_v37  ;;  %v3931_v37 = vpack.c.bf16 %v1352_v35, %v1351_v34 }
 0x860   :  { %v4068_v38 = vpop.eup %4067 }
 0x861   :  { %v899_v40 = vmul.f32 %v4068_v38, %v887_v27  ;;  %v1269_v27 = vld [vmem:[#allocation5 + $0x348] sm:$0xff] }
 0x862   :  { %v3925_v29 = vpack.c.bf16 %v1270_v28, %v1269_v27  ;;  %v1613_v27 = vld [vmem:[#allocation5 + $0x288] sm:$0xff]  ;;  %v1614_v28 = vld [vmem:[#allocation5 + $0x290] sm:$0xff] }
 0x863   :  { %v905_v42 = vmul.f32 %v3211_v39, %v899_v40  ;;  %v1353_v39 = vld [vmem:[#allocation5 + $0x380] sm:$0xff]  ;;  %v1354_v40 = vld [vmem:[#allocation5 + $0x388] sm:$0xff] }
 0x864   :  { %3926 = vmatpush3.bf16.msra.mxu0 %v3925_v29  ;;  %v3949_v29 = vpack.c.bf16 %v1614_v28, %v1613_v27  ;;  %v1911_v27 = vld [vmem:[#allocation5 + $0x190] sm:$0xff] }
 0x865   :  { %v911_v43 = vadd.f32 %v3212_v41, %v905_v42  ;;  %3927 = vmatprep.subr.bf16.mxu0 %v4168_v0  ;;  %v3934_v41 = vpack.c.bf16 %v1354_v40, %v1353_v39  ;;  %v1272_v42 = vld [vmem:[#allocation5 + $0x360] sm:$0xff]  ;;  %v1794_v39 = vld [vmem:[#allocation5 + $0x2b0] sm:$0xff] }
 0x867   :  { %v912_v44 = vmax.f32 %v911_v43, 0.0 }
 0x869   :  { %3572 = vmatmul.mubr.msk.f32.vlgmr.msra.gmra.mrb[6].mxu1 %vm161_vm3, %v912_v44  ;;  %v3219_v44 = vld [vmem:[#allocation5 + $0x340] ss:$0 sm:$0xff] }
 0x86a   :  { %3582 = vmatprep.mubr.msk.f32.mxu1 %vm4169_vm0, %v4170_v1  ;;  %3908 = vmatpush3.bf16.msra.mxu1 %v3907_v47 }
 0x86b   :  { %3909 = vmatprep.subr.bf16.mxu1 %v4168_v0 }
 0x86e   :  { %3911 = vmatpush3.bf16.msra.mxu1 %v3910_v50  ;;  %v3937_v50 = vpack.c.bf16 %v1432_v46, %v1431_v45 }
 0x86f   :  { %3918 = vmatprep.subr.bf16.mxu1 %v4168_v0 }
 0x93c   :  { %v986_v51 = vpop.f32.mrb[6].mxu1 }
 0x93d   :  { %v990_v52 = vsel %vm121_vm2, %v986_v51, 0.0  ;;  %v3573_v53 = vpop.f32.mrb[7].mxu1 }
 0x93e   :  { %v991_v54 = vrot.slane %v990_v52, 4  ;;  %v1434_v53 = vld [vmem:[#allocation5 + $0x3b0] sm:$0xff] }
 0x940   :  { %v992_v55 = vadd.f32 %v991_v54, %v990_v52  ;;  %v1433_v52 = vld [vmem:[#allocation5 + $0x3a8] sm:$0xff]  ;;  %v3223_v54 = vld [vmem:[#allocation5 + $0x390] ss:$0 sm:$0xff] }
 0x942   :  { %v993_v56 = vrot.slane %v992_v55, 2 }
 0x944   :  { %v994_v57 = vadd.f32 %v993_v56, %v992_v55  ;;  %v3940_v55 = vpack.c.bf16 %v1434_v53, %v1433_v52 }
 0x946   :  { %v995_v59 = vrot.slane %v994_v57, 1 }
 0x948   :  { %v996_v60 = vadd.f32 %v995_v59, %v994_v57 }
 0x94a   :  { %v997_v61 = vmul.f32 0.5, %v996_v60 }
 0x94c   :  { %v998_v62 = vsub.f32 %v986_v51, %v997_v61  ;;  %v1514_v61 = vld [vmem:[#allocation5 + $0x3c0] sm:$0xff] }
 0x94e   :  { %v999_v63 = vmul.f32 %v998_v62, %v998_v62 }
 0x950   :  { %v1000_v2 = vsel %vm121_vm2, %v999_v63, 0.0 }
 0x951   :  { %v1001_v3 = vrot.slane %v1000_v2, 4 }
 0x953   :  { %v1002_v4 = vadd.f32 %v1001_v3, %v1000_v2  ;;  %v1516_v2 = vld [vmem:[#allocation5 + $0x3d0] sm:$0xff]  ;;  %v1517_v3 = vld [vmem:[#allocation5 + $0x3d8] sm:$0xff] }
 0x955   :  { %v1003_v6 = vrot.slane %v1002_v4, 2 }
 0x957   :  { %v1004_v7 = vadd.f32 %v1003_v6, %v1002_v4  ;;  %v3946_v4 = vpack.c.bf16 %v1517_v3, %v1516_v2  ;;  %v3221_v6 = vld [vmem:[#allocation5 + $0x368] ss:$0 sm:$0xff] }
 0x959   :  { %v1005_v8 = vrot.slane %v1004_v7, 1 }
 0x95b   :  { %v1006_v9 = vadd.f32 %v1005_v8, %v1004_v7 }
 0x95d   :  { %v1007_v10 = vmul.f32 0.5, %v1006_v9 }
 0x95f   :  { %v1008_v11 = vadd.f32 1e-05, %v1007_v10 }
 0x961   :  { %4069 = vrsqrt.f32 %v1008_v11 }
 0x96b   :  { %v4070_v12 = vpop.eup %4069 }
 0x96c   :  { %v1010_v15 = vmul.f32 %v4070_v12, %v998_v62  ;;  %v1515_v62 = vld [vmem:[#allocation5 + $0x3c8] sm:$0xff]  ;;  %v3225_v12 = vld [vmem:[#allocation5 + $0x3b8] ss:$0 sm:$0xff] }
 0x96d   :  { %v3943_v63 = vpack.c.bf16 %v1515_v62, %v1514_v61 }
 0x96e   :  { %v1016_v17 = vmul.f32 %v3214_v13, %v1010_v15  ;;  %v1609_v13 = vld [vmem:[#allocation5 + $0x268] sm:$0xff]  ;;  %v1610_v15 = vld [vmem:[#allocation5 + $0x270] sm:$0xff] }
 0x96f   :  { %v4364_v19 = vpack.c.bf16 %v1610_v15, %v1609_v13 }
 0x970   :  { %v1022_v20 = vadd.f32 %v3215_v16, %v1016_v17 }
 0x972   :  { %v4333_v23 = vmax.f32 %v1022_v20, 0.0 }
 0x974   :  { %3583 = vmatmul.mubr.msk.f32.vlgmr.msra.gmra.mrb[8].mxu1 %vm161_vm3, %v4333_v23 }
 0x975   :  { %3920 = vmatpush3.bf16.msra.mxu1 %v3919_v21  ;;  %3604 = vmatprep.mubr.msk.f32.mxu1 %vm4169_vm0, %v4170_v1  ;;  %v1611_v21 = vld [vmem:[#allocation5 + $0x278] sm:$0xff] }
 0x976   :  { %3921 = vmatprep.subr.bf16.mxu1 %v4168_v0  ;;  %v4368_v25 = vpack.c.bf16 %v1612_v24, %v1611_v21  ;;  %v1909_v21 = vld [vmem:[#allocation5 + $0x180] sm:$0xff] }
 0x979   :  { %3923 = vmatpush3.bf16.msra.mxu1 %v3922_v26 }
 0x97a   :  { %3930 = vmatprep.subr.bf16.mxu1 %v4168_v0 }
 0xa47   :  { %v1101_v30 = vpop.f32.mrb[8].mxu1 }
 0xa48   :  { %v1176_v32 = vadd.f32 %v4323_v22, %v1101_v30  ;;  %v3584_v33 = vpop.f32.mrb[9].mxu1  ;;  %v1271_v22 = vld [vmem:[#allocation5 + $0x358] sm:$0xff] }
 0xa49   :  { %v3928_v43 = vpack.c.bf16 %v1272_v42, %v1271_v22  ;;  %v1796_v22 = vld [vmem:[#allocation5 + $0x2c0] sm:$0xff] }
 0xa4a   :  { %v1184_v36 = vadd.f32 %v3218_v31, %v1176_v32  ;;  %v3227_v32 = vld [vmem:[#allocation5 + $0x3e0] ss:$0 sm:$0xff] }
 0xa4b   :  { %3929 = vmatpush3.bf16.msra.mxu0 %v3928_v43 }
 0xa4c   :  { %v1185_v38 = vmax.f32 %v1184_v36, 0.0  ;;  %3936 = vmatprep.subr.bf16.mxu0 %v4168_v0 }
 0xa4e   :  { %3605 = vmatmul.mubr.msk.f32.vlgmr.msra.gmra.mrb[10].mxu1 %vm161_vm3, %v1185_v38 }
 0xa4f   :  { %3932 = vmatpush3.bf16.msra.mxu1 %v3931_v37  ;;  %3626 = vmatprep.mubr.msk.f32.mxu1 %vm4169_vm0, %v4170_v1 }
 0xa50   :  { %3933 = vmatprep.subr.bf16.mxu1 %v4168_v0 }
 0xa53   :  { %3935 = vmatpush3.bf16.msra.mxu1 %v3934_v41  ;;  %v1795_v41 = vld [vmem:[#allocation5 + $0x2b8] sm:$0xff] }
 0xa54   :  { %3942 = vmatprep.subr.bf16.mxu1 %v4168_v0  ;;  %v4391_v42 = vpack.c.bf16 %v1796_v22, %v1795_v41 }
 0xa56   :  { %3627 = vmatmul.mubr.msk.f32.vlgmr.msra.gmra.mrb[12].mxu1 %vm161_vm3, %v4333_v23 }
 0xa57   :  { %3648 = vmatprep.mubr.msk.f32.mxu1 %vm4169_vm0, %v4170_v1  ;;  %3944 = vmatpush3.bf16.msra.mxu1 %v3943_v63 }
 0xa58   :  { %3945 = vmatprep.subr.bf16.mxu1 %v4168_v0 }
 0xa5b   :  { %3947 = vmatpush3.bf16.msra.mxu1 %v3946_v4 }
 0xa5c   :  { %3951 = vmatprep.subr.bf16.mxu1 %v4168_v0 }
 0xb21   :  { %v1264_v47 = vpop.f32.mrb[10].mxu1 }
 0xb22   :  { %v1265_v48 = vadd.f32 %v3219_v44, %v1264_v47  ;;  %v3606_v49 = vpop.f32.mrb[11].mxu1 }
 0xb24   :  { %v1268_v51 = vmax.f32 %v1265_v48, 0.0 }
 0xb26   :  { %3616 = vmatmul.mubr.msk.f32.vlgmr.msra.gmra.mrb[12].mxu0 %vm161_vm3, %v1268_v51 }
 0xb27   :  { %3938 = vmatpush3.bf16.msra.mxu0 %v3937_v50  ;;  %3637 = vmatprep.mubr.msk.f32.mxu0 %vm4169_vm0, %v4170_v1 }
 0xb28   :  { %3939 = vmatprep.subr.bf16.mxu0 %v4168_v0 }
 0xb29   :  { %v1426_v56 = vpop.f32.mrb[12].mxu1 }
 0xb2a   :  { %v1427_v57 = vadd.f32 %v3223_v54, %v1426_v56  ;;  %v3628_v59 = vpop.f32.mrb[13].mxu1 }
 0xb2b   :  { %3941 = vmatpush3.bf16.msra.mxu0 %v3940_v55 }
 0xb2c   :  { %v1430_v60 = vmax.f32 %v1427_v57, 0.0  ;;  %3948 = vmatprep.subr.bf16.mxu0 %v4168_v0 }
 0xb2e   :  { %3638 = vmatmul.mubr.msk.f32.vlgmr.msra.gmra.mrb[14].mxu0 %vm161_vm3, %v1430_v60 }
 0xb2f   :  { %3655 = vmatprep.mubr.msk.f32.mxu0 %vm4169_vm0, %v4170_v1  ;;  %3950 = vmatpush3.bf16.msra.mxu0 %v3949_v29 }
 0xb30   :  { %3957 = vmatprep.subr.bf16.mxu0 %v4168_v0 }
 0xbf9   :  { %v1347_v7 = vpop.f32.mrb[12].mxu0 }
 0xbfa   :  { %v1348_v8 = vadd.f32 %v3221_v6, %v1347_v7  ;;  %v3617_v9 = vpop.f32.mrb[13].mxu0  ;;  %v4400_v6 = vld [vmem:[#allocation5 + $0x298] ss:$0 sm:$0xff] }
 0xbfc   :  { %v1596_v10 = vmul.f32 0.5, %v1348_v8  ;;  %3168 = vst.msk [vmem:[#allocation7 + $0xa] sm:$0x3] %vm121_vm2, %v1348_v8 }
 0xbfe   :  { %v1597_v11 = vmul.f32 1.442695, %v1596_v10  ;;  %v1904_v10 = vld [vmem:[#allocation5 + $0x158] sm:$0xff] }
 0xc00   :  { %4071 = vpow2.f32 %v1597_v11  ;;  %v1905_v11 = vld [vmem:[#allocation5 + $0x160] sm:$0xff] }
 0xc01   :  { %v1509_v16 = vpop.f32.mrb[14].mxu0  ;;  %v3970_v13 = vpack.c.bf16 %v1905_v11, %v1904_v10  ;;  %v3238_v10 = vld [vmem:[#allocation5 + $0x198] ss:$0 sm:$0xff] }
 0xc02   :  { %v1510_v17 = vadd.f32 %v3225_v12, %v1509_v16  ;;  %v3639_v18 = vpop.f32.mrb[15].mxu0  ;;  %v1906_v16 = vld [vmem:[#allocation5 + $0x168] sm:$0xff] }
 0xc04   :  { %v1513_v20 = vmax.f32 %v1510_v17, 0.0  ;;  %v1907_v17 = vld [vmem:[#allocation5 + $0x170] sm:$0xff] }
 0xc05   :  { %v3973_v18 = vpack.c.bf16 %v1907_v17, %v1906_v16 }
 0xc06   :  { %3649 = vmatmul.mubr.msk.f32.vlgmr.msra.gmra.mrb[14].mxu1 %vm161_vm3, %v1513_v20  ;;  %v1908_v20 = vld [vmem:[#allocation5 + $0x178] sm:$0xff] }
 0xc07   :  { %3953 = vmatpush3.bf16.msra.mxu1 %v4364_v19  ;;  %3666 = vmatprep.mubr.msk.f32.mxu1 %vm4169_vm0, %v4170_v1  ;;  %v3964_v24 = vpack.c.bf16 %v1909_v21, %v1908_v20  ;;  %v2231_v20 = vld [vmem:[#allocation5 + $0x200] sm:$0xff]  ;;  %v2232_v21 = vld [vmem:[#allocation5 + $0x208] sm:$0xff] }
 0xc08   :  { %3954 = vmatprep.subr.bf16.mxu1 %v4168_v0 }
 0xc0a   :  { %v4072_v26 = vpop.eup %4071 }
 0xc0b   :  { %3956 = vmatpush3.bf16.msra.mxu1 %v4368_v25  ;;  %1600 = vrot.lane.b32.xlu0 %v4072_v26, %s4172_s6  ;;  %v1910_v26 = vld [vmem:[#allocation5 + $0x188] sm:$0xff] }
 0xc0c   :  { %3963 = vmatprep.subr.bf16.mxu1 %v4168_v0  ;;  %v3967_v28 = vpack.c.bf16 %v1911_v27, %v1910_v26  ;;  %v2149_v26 = vld [vmem:[#allocation5 + $0x1d8] sm:$0xff]  ;;  %v2150_v27 = vld [vmem:[#allocation5 + $0x1e0] sm:$0xff] }
 0xc0e   :  { %3667 = vmatmul.mubr.msk.f32.vlgmr.msra.gmra.mrb[16].mxu1 %vm161_vm3, %v4333_v23 }
 0xc0f   :  { %3688 = vmatprep.mubr.msk.f32.mxu1 %vm4169_vm0, %v4170_v1  ;;  %3965 = vmatpush3.bf16.msra.mxu1 %v3964_v24  ;;  %v3991_v24 = vpack.c.bf16 %v2232_v21, %v2231_v20 }
 0xc10   :  { %3966 = vmatprep.subr.bf16.mxu1 %v4168_v0 }
 0xc13   :  { %3968 = vmatpush3.bf16.msra.mxu1 %v3967_v28  ;;  %v3985_v28 = vpack.c.bf16 %v2150_v27, %v2149_v26 }
 0xc14   :  { %3975 = vmatprep.subr.bf16.mxu1 %v4168_v0 }
 0xc7d   :  { %v1601_v30 = vpop.permute.xlu0 %1600 }
 0xc7e   :  { %v1603_v31 = vmul.f32 %v1601_v30, %v4242_v14  ;;  %v1793_v14 = vld [vmem:[#allocation5 + $0x2a8] sm:$0xff] }
 0xc7f   :  { %v4387_v40 = vpack.c.bf16 %v1794_v39, %v1793_v14 }
 0xc80   :  { %1605 = vrot.lane.b32.xlu1 %v1603_v31, %s4172_s6 }
 0xcd9   :  { %v1592_v33 = vpop.f32.mrb[14].mxu1 }
 0xcda   :  { %v1593_v34 = vadd.f32 %v3227_v32, %v1592_v33  ;;  %v3650_v35 = vpop.f32.mrb[15].mxu1 }
 0xcdc   :  { %3174 = vst.msk [vmem:[#allocation7 + $0x10] sm:$0x3] %vm121_vm2, %v1593_v34 }
 0xce1   :  { %v1755_v23 = vpop.f32.mrb[16].mxu1 }
 0xce2   :  { %v3668_v36 = vpop.f32.mrb[17].mxu1 }
 0xcf2   :  { %v1606_v37 = vpop.permute.xlu1 %1605 }
 0xcf3   :  { %v1608_v38 = vadd.f32 %v1606_v37, %v1348_v8  ;;  %v4402_v8 = vld [vmem:[#allocation5 + $0x2a0] ss:$0 sm:$0xff] }
 0xcf5   :  { %3162 = vst.msk [vmem:[#allocation7 + $0x4] sm:$0x3] %vm3161_vm7, %v1608_v38  ;;  %3656 = vmatmul.mubr.msk.f32.vlgmr.msra.gmra.mrb[16].mxu0 %vm1615_vm8, %v1608_v38 }
 0xcf6   :  { %3677 = vmatprep.mubr.msk.f32.mxu0 %vm4169_vm0, %v4170_v1  ;;  %3959 = vmatpush3.bf16.msra.mxu0 %v4387_v40 }
 0xcf7   :  { %3960 = vmatprep.subr.bf16.mxu0 %v4168_v0 }
 0xcfa   :  { %3962 = vmatpush3.bf16.msra.mxu0 %v4391_v42 }
 0xcfb   :  { %3969 = vmatprep.subr.bf16.mxu0 %v4168_v0 }
 0xdc8   :  { %v4395_v43 = vpop.f32.mrb[16].mxu0 }
 0xdc9   :  { %v1756_v44 = vadd.f32 %v1755_v23, %v4395_v43  ;;  %v3657_v45 = vpop.f32.mrb[17].mxu0 }
 0xdcb   :  { %v1759_v46 = vsel %vm121_vm2, %v1756_v44, 0.0 }
 0xdcc   :  { %v1760_v47 = vrot.slane %v1759_v46, 4 }
 0xdce   :  { %v1761_v48 = vadd.f32 %v1760_v47, %v1759_v46 }
 0xdd0   :  { %v1762_v49 = vrot.slane %v1761_v48, 2 }
 0xdd2   :  { %v1763_v50 = vadd.f32 %v1762_v49, %v1761_v48 }
 0xdd4   :  { %v1764_v51 = vrot.slane %v1763_v50, 1 }
 0xdd6   :  { %v1765_v52 = vadd.f32 %v1764_v51, %v1763_v50 }
 0xdd8   :  { %v1766_v53 = vmul.f32 0.5, %v1765_v52  ;;  %v4419_v52 = vld [vmem:[#allocation5 + $0x2c8] ss:$0 sm:$0xff] }
 0xdda   :  { %v1767_v54 = vsub.f32 %v1756_v44, %v1766_v53 }
 0xddc   :  { %v1768_v55 = vmul.f32 %v1767_v54, %v1767_v54 }
 0xdde   :  { %v1769_v56 = vsel %vm121_vm2, %v1768_v55, 0.0 }
 0xddf   :  { %v1770_v57 = vrot.slane %v1769_v56, 4 }
 0xde1   :  { %v1771_v59 = vadd.f32 %v1770_v57, %v1769_v56  ;;  %v2064_v56 = vld [vmem:[#allocation5 + $0x1a0] sm:$0xff]  ;;  %v2065_v57 = vld [vmem:[#allocation5 + $0x1a8] sm:$0xff] }
 0xde3   :  { %v1772_v60 = vrot.slane %v1771_v59, 2 }
 0xde5   :  { %v1773_v61 = vadd.f32 %v1772_v60, %v1771_v59  ;;  %v3976_v60 = vpack.c.bf16 %v2065_v57, %v2064_v56 }
 0xde7   :  { %v1774_v62 = vrot.slane %v1773_v61, 1 }
 0xde9   :  { %v1775_v63 = vadd.f32 %v1774_v62, %v1773_v61  ;;  %v2066_v62 = vld [vmem:[#allocation5 + $0x1b0] sm:$0xff] }
 0xdeb   :  { %v1776_v2 = vmul.f32 0.5, %v1775_v63  ;;  %v2067_v63 = vld [vmem:[#allocation5 + $0x1b8] sm:$0xff] }
 0xded   :  { %v1777_v3 = vadd.f32 1e-05, %v1776_v2  ;;  %v3979_v2 = vpack.c.bf16 %v2067_v63, %v2066_v62 }
 0xdef   :  { %4073 = vrsqrt.f32 %v1777_v3  ;;  %v2147_v3 = vld [vmem:[#allocation5 + $0x1c8] sm:$0xff] }
 0xdf9   :  { %v4074_v4 = vpop.eup %4073 }
 0xdfa   :  { %v1779_v7 = vmul.f32 %v4074_v4, %v1767_v54  ;;  %v4421_v54 = vld [vmem:[#allocation5 + $0x2d0] ss:$0 sm:$0xff] }
 0xdfb   :  { %v2148_v4 = vld [vmem:[#allocation5 + $0x1d0] sm:$0xff] }
 0xdfc   :  { %v1785_v9 = vmul.f32 %v4400_v6, %v1779_v7  ;;  %v3982_v7 = vpack.c.bf16 %v2148_v4, %v2147_v3 }
 0xdfe   :  { %v1791_v12 = vadd.f32 %v4402_v8, %v1785_v9 }
 0xe00   :  { %v1792_v15 = vmax.f32 %v1791_v12, 0.0 }
 0xe02   :  { %3678 = vmatmul.mubr.msk.f32.vlgmr.msra.gmra.mrb[18].mxu0 %vm161_vm3, %v1792_v15  ;;  %v2230_v15 = vld [vmem:[#allocation5 + $0x1f8] sm:$0xff] }
 0xe03   :  { %3971 = vmatpush3.bf16.msra.mxu0 %v3970_v13  ;;  %3699 = vmatprep.mubr.msk.f32.mxu0 %vm4169_vm0, %v4170_v1  ;;  %v2229_v13 = vld [vmem:[#allocation5 + $0x1f0] sm:$0xff] }
 0xe04   :  { %3972 = vmatprep.subr.bf16.mxu0 %v4168_v0  ;;  %v3988_v17 = vpack.c.bf16 %v2230_v15, %v2229_v13 }
 0xe07   :  { %3974 = vmatpush3.bf16.msra.mxu0 %v3973_v18 }
 0xe08   :  { %3981 = vmatprep.subr.bf16.mxu0 %v4168_v0 }
 0xe0a   :  { %3700 = vmatmul.mubr.msk.f32.vlgmr.msra.gmra.mrb[20].mxu0 %vm161_vm3, %v4269_v5 }
 0xe0b   :  { %3721 = vmatprep.mubr.msk.f32.mxu0 %vm4169_vm0, %v4170_v1  ;;  %3983 = vmatpush3.bf16.msra.mxu0 %v3982_v7 }
 0xe0c   :  { %3984 = vmatprep.subr.bf16.mxu0 %v4168_v0 }
 0xe0f   :  { %3986 = vmatpush3.bf16.msra.mxu0 %v3985_v28 }
 0xe10   :  { %3993 = vmatprep.subr.bf16.mxu0 %v4168_v0 }
 0xed5   :  { %v1866_v29 = vpop.f32.mrb[18].mxu0 }
 0xed6   :  { %v1870_v30 = vsel %vm121_vm2, %v1866_v29, 0.0  ;;  %v3679_v31 = vpop.f32.mrb[19].mxu0 }
 0xed7   :  { %v1871_v5 = vrot.slane %v1870_v30, 4  ;;  %v2310_v31 = vld [vmem:[#allocation5 + $0x220] sm:$0xff] }
 0xed9   :  { %v1872_v32 = vadd.f32 %v1871_v5, %v1870_v30  ;;  %v2309_v30 = vld [vmem:[#allocation5 + $0x218] sm:$0xff] }
 0xedb   :  { %v1873_v33 = vrot.slane %v1872_v32, 2 }
 0xedd   :  { %v1874_v34 = vadd.f32 %v1873_v33, %v1872_v32  ;;  %v2053_v35 = vpop.f32.mrb[20].mxu0 }
 0xede   :  { %v3701_v23 = vpop.f32.mrb[21].mxu0 }
 0xedf   :  { %v1875_v36 = vrot.slane %v1874_v34, 1  ;;  %v2311_v23 = vld [vmem:[#allocation5 + $0x228] sm:$0xff] }
 0xee1   :  { %v1876_v37 = vadd.f32 %v1875_v36, %v1874_v34  ;;  %v3994_v34 = vpack.c.bf16 %v2310_v31, %v2309_v30  ;;  %v2312_v36 = vld [vmem:[#allocation5 + $0x230] sm:$0xff] }
 0xee3   :  { %v1877_v38 = vmul.f32 0.5, %v1876_v37  ;;  %v3243_v37 = vld [vmem:[#allocation5 + $0x210] ss:$0 sm:$0xff] }
 0xee5   :  { %v1878_v14 = vsub.f32 %v1866_v29, %v1877_v38  ;;  %v3239_v29 = vld [vmem:[#allocation5 + $0x1c0] ss:$0 sm:$0xff]  ;;  %v3997_v38 = vpack.c.bf16 %v2312_v36, %v2311_v23 }
 0xee7   :  { %v1879_v39 = vmul.f32 %v1878_v14, %v1878_v14 }
 0xee9   :  { %v1880_v41 = vsel %vm121_vm2, %v1879_v39, 0.0 }
 0xeea   :  { %v1881_v22 = vrot.slane %v1880_v41, 4 }
 0xeec   :  { %v1882_v44 = vadd.f32 %v1881_v22, %v1880_v41 }
 0xeee   :  { %v1883_v45 = vrot.slane %v1882_v44, 2 }
 0xef0   :  { %v1884_v46 = vadd.f32 %v1883_v45, %v1882_v44  ;;  %v2392_v44 = vld [vmem:[#allocation5 + $0x240] sm:$0xff]  ;;  %v2393_v45 = vld [vmem:[#allocation5 + $0x248] sm:$0xff] }
 0xef2   :  { %v1885_v47 = vrot.slane %v1884_v46, 1 }
 0xef4   :  { %v1886_v48 = vadd.f32 %v1885_v47, %v1884_v46  ;;  %v4000_v46 = vpack.c.bf16 %v2393_v45, %v2392_v44  ;;  %v2395_v47 = vld [vmem:[#allocation5 + $0x258] sm:$0xff] }
 0xef6   :  { %v1887_v49 = vmul.f32 0.5, %v1886_v48 }
 0xef8   :  { %v1888_v50 = vadd.f32 1e-05, %v1887_v49 }
 0xefa   :  { %4075 = vrsqrt.f32 %v1888_v50 }
 0xf04   :  { %v4076_v51 = vpop.eup %4075 }
 0xf05   :  { %v1890_v53 = vmul.f32 %v4076_v51, %v1878_v14 }
 0xf07   :  { %v1896_v55 = vmul.f32 %v4419_v52, %v1890_v53 }
 0xf09   :  { %v1902_v59 = vadd.f32 %v4421_v54, %v1896_v55  ;;  %v3245_v55 = vld [vmem:[#allocation5 + $0x238] ss:$0 sm:$0xff] }
 0xf0b   :  { %v1903_v61 = vmax.f32 %v1902_v59, 0.0 }
 0xf0d   :  { %3689 = vmatmul.mubr.msk.f32.vlgmr.msra.gmra.mrb[18].mxu1 %vm161_vm3, %v1903_v61 }
 0xf0e   :  { %3977 = vmatpush3.bf16.msra.mxu1 %v3976_v60  ;;  %3710 = vmatprep.mubr.msk.f32.mxu1 %vm4169_vm0, %v4170_v1 }
 0xf0f   :  { %3978 = vmatprep.subr.bf16.mxu1 %v4168_v0 }
 0xf12   :  { %3980 = vmatpush3.bf16.msra.mxu1 %v3979_v2 }
 0xf13   :  { %3987 = vmatprep.subr.bf16.mxu1 %v4168_v0 }
 0xfe0   :  { %v1981_v9 = vpop.f32.mrb[18].mxu1 }
 0xfe1   :  { %v2054_v11 = vadd.f32 %v2053_v35, %v1981_v9  ;;  %v3690_v12 = vpop.f32.mrb[19].mxu1 }
 0xfe3   :  { %v2062_v16 = vadd.f32 %v3238_v10, %v2054_v11 }
 0xfe5   :  { %v2063_v18 = vmax.f32 %v2062_v16, 0.0 }
 0xfe7   :  { %3711 = vmatmul.mubr.msk.f32.vlgmr.msra.gmra.mrb[20].mxu1 %vm161_vm3, %v2063_v18 }
 0xfe8   :  { %3989 = vmatpush3.bf16.msra.mxu1 %v3988_v17  ;;  %3732 = vmatprep.mubr.msk.f32.mxu1 %vm4169_vm0, %v4170_v1 }
 0xfe9   :  { %3990 = vmatprep.subr.bf16.mxu1 %v4168_v0 }
 0xfec   :  { %3992 = vmatpush3.bf16.msra.mxu1 %v3991_v24 }
 0xfed   :  { %3999 = vmatprep.subr.bf16.mxu1 %v4168_v0 }
 0xfef   :  { %3733 = vmatmul.mubr.msk.f32.vlgmr.msra.gmra.mrb[22].mxu1 %vm161_vm3, %v1903_v61 }
 0xff0   :  { %3754 = vmatprep.mubr.msk.f32.mxu1 %vm4169_vm0, %v4170_v1  ;;  %4001 = vmatpush3.bf16.msra.mxu1 %v4000_v46 }
 0xff1   :  { %4002 = vmatprep.subr.bf16.mxu1 %v4168_v0 }
0x10ba   :  { %v2142_v5 = vpop.f32.mrb[20].mxu1 }
0x10bb   :  { %v2143_v32 = vadd.f32 %v3239_v29, %v2142_v5  ;;  %v3712_v33 = vpop.f32.mrb[21].mxu1  ;;  %v2682_v5 = vld [vmem:[#allocation5 + $0x110] sm:$0xff] }
0x10bc   :  { %v4091_v33 = vld [vmem:[#allocation2] sm:$0x3] }
0x10bd   :  { %v2146_v35 = vmax.f32 %v2143_v32, 0.0 }
0x10bf   :  { %3722 = vmatmul.mubr.msk.f32.vlgmr.msra.gmra.mrb[22].mxu0 %vm161_vm3, %v2146_v35  ;;  %v3247_v35 = vld [vmem:[#allocation5 + $0x260] ss:$0 sm:$0xff] }
0x10c0   :  { %3995 = vmatpush3.bf16.msra.mxu0 %v3994_v34  ;;  %3743 = vmatprep.mubr.msk.f32.mxu0 %vm4169_vm0, %v4170_v1 }
0x10c1   :  { %3996 = vmatprep.subr.bf16.mxu0 %v4168_v0 }
0x10c2   :  { %v2304_v14 = vpop.f32.mrb[22].mxu1 }
0x10c3   :  { %v2305_v39 = vadd.f32 %v3243_v37, %v2304_v14  ;;  %v3734_v41 = vpop.f32.mrb[23].mxu1  ;;  %v2679_v37 = vld [vmem:[#allocation5 + $0xf8] sm:$0xff] }
0x10c4   :  { %3998 = vmatpush3.bf16.msra.mxu0 %v3997_v38  ;;  %v2680_v41 = vld [vmem:[#allocation5 + $0x100] sm:$0xff] }
0x10c5   :  { %v2308_v22 = vmax.f32 %v2305_v39, 0.0  ;;  %4005 = vmatprep.subr.bf16.mxu0 %v4168_v0 }
0x10c7   :  { %3744 = vmatmul.mubr.msk.f32.vlgmr.msra.gmra.mrb[24].mxu0 %vm161_vm3, %v2308_v22  ;;  %v2681_v22 = vld [vmem:[#allocation5 + $0x108] sm:$0xff] }
0x10c8   :  { %4007 = vmatpush3.bf16.msra.mxu0 %v4364_v19  ;;  %3765 = vmatprep.mubr.msk.f32.mxu0 %vm4169_vm0, %v4170_v1  ;;  %v2394_v19 = vld [vmem:[#allocation5 + $0x250] sm:$0xff]  ;;  %v4021_v44 = vpack.c.bf16 %v2681_v22, %v2680_v41  ;;  %v2975_v22 = vld [vmem:[#allocation5 + $0x500] sm:$0xff] }
0x10c9   :  { %4008 = vmatprep.subr.bf16.mxu0 %v4168_v0  ;;  %v4003_v48 = vpack.c.bf16 %v2395_v47, %v2394_v19 }
0x10cb   :  { %4004 = vmatpush3.bf16.msra.mxu1 %v4003_v48 }
0x10cc   :  { %4010 = vmatpush3.bf16.msra.mxu0 %v4368_v25  ;;  %4011 = vmatprep.subr.bf16.mxu1 %v4168_v0  ;;  %v3241_v25 = vld [vmem:[#allocation5 + $0x1e8] ss:$0 sm:$0xff] }
0x10cd   :  { %3779 = vmatprep.subr.mxu0 %v4170_v1 }
0x10cf   :  { %3766 = vmatmul.mubr.msk.f32.vlgmr.msra.gmra.mrb[26].mxu0 %vm161_vm3, %v4301_v58 }
0x10d0   :  { %3781 = vmatprep.mubr.msk.f32.mxu0 %vm4169_vm0, %v4170_v1  ;;  %3780 = vmatpush3.msra.mxu0 %v2682_v5 }
0x10d1   :  { %4017 = vmatprep.subr.bf16.mxu0 %v4168_v0 }
0x1192   :  { %v2225_v49 = vpop.f32.mrb[22].mxu0 }
0x1193   :  { %v4458_v50 = vadd.f32 %v3241_v25, %v2225_v49  ;;  %v3723_v58 = vpop.f32.mrb[23].mxu0 }
0x1195   :  { %v2474_v51 = vmul.f32 0.5, %v4458_v50  ;;  %3166 = vst.msk [vmem:[#allocation7 + $0x8] sm:$0x3] %vm3161_vm7, %v4458_v50 }
0x1197   :  { %v2475_v53 = vmul.f32 1.442695, %v2474_v51 }
0x1199   :  { %4077 = vpow2.f32 %v2475_v53 }
0x119a   :  { %v2387_v56 = vpop.f32.mrb[24].mxu0 }
0x119b   :  { %v2388_v57 = vadd.f32 %v3245_v55, %v2387_v56  ;;  %v3745_v59 = vpop.f32.mrb[25].mxu0 }
0x119d   :  { %v2391_v60 = vmax.f32 %v2388_v57, 0.0 }
0x119f   :  { %3755 = vmatmul.mubr.msk.f32.vlgmr.msra.gmra.mrb[24].mxu1 %vm161_vm3, %v2391_v60 }
0x11a0   :  { %4013 = vmatpush3.bf16.msra.mxu1 %v4387_v40  ;;  %3776 = vmatprep.mubr.msk.f32.mxu1 %vm4169_vm0, %v4170_v1 }
0x11a1   :  { %4014 = vmatprep.subr.bf16.mxu1 %v4168_v0 }
0x11a2   :  { %v2553_v61 = vpop.f32.mrb[26].mxu0 }
0x11a3   :  { %v4078_v62 = vpop.eup %4077  ;;  %v2554_v63 = vadd.f32 %v2553_v61, %v4395_v43  ;;  %v3767_v2 = vpop.f32.mrb[27].mxu0 }
0x11a4   :  { %2478 = vrot.lane.b32.xlu0 %v4078_v62, %s4172_s6  ;;  %4016 = vmatpush3.bf16.msra.mxu1 %v4391_v42 }
0x11a5   :  { %v2557_v3 = vsel %vm121_vm2, %v2554_v63, 0.0  ;;  %4023 = vmatprep.subr.bf16.mxu1 %v4168_v0 }
0x11a6   :  { %v2558_v4 = vrot.slane %v2557_v3, 4 }
0x11a8   :  { %v2559_v40 = vadd.f32 %v2558_v4, %v2557_v3 }
0x11aa   :  { %v2560_v7 = vrot.slane %v2559_v40, 2 }
0x11ac   :  { %v2561_v9 = vadd.f32 %v2560_v7, %v2559_v40 }
0x11ae   :  { %v2562_v10 = vrot.slane %v2561_v9, 1 }
0x11b0   :  { %v2563_v11 = vadd.f32 %v2562_v10, %v2561_v9 }
0x11b2   :  { %v2564_v12 = vmul.f32 0.5, %v2563_v11  ;;  %v2864_v11 = vld [vmem:[#allocation5 + $0x128] sm:$0xff] }
0x11b4   :  { %v2565_v13 = vsub.f32 %v2554_v63, %v2564_v12  ;;  %v2865_v12 = vld [vmem:[#allocation5 + $0x130] sm:$0xff] }
0x11b6   :  { %v2566_v15 = vmul.f32 %v2565_v13, %v2565_v13 }
0x11b8   :  { %v2567_v43 = vsel %vm121_vm2, %v2566_v15, 0.0  ;;  %v2866_v15 = vld [vmem:[#allocation5 + $0x138] sm:$0xff] }
0x11b9   :  { %v2568_v16 = vrot.slane %v2567_v43, 4 }
0x11bb   :  { %v2569_v17 = vadd.f32 %v2568_v16, %v2567_v43  ;;  %v2867_v43 = vld [vmem:[#allocation5 + $0x140] sm:$0xff] }
0x11bc   :  { %v4027_v16 = vpack.c.bf16 %v2867_v43, %v2866_v15  ;;  %v3257_v15 = vld [vmem:[#allocation5 + $0x150] ss:$0 sm:$0xff] }
0x11bd   :  { %v2570_v18 = vrot.slane %v2569_v17, 2 }
0x11bf   :  { %v2571_v20 = vadd.f32 %v2570_v18, %v2569_v17 }
0x11c1   :  { %v2572_v42 = vrot.slane %v2571_v20, 1 }
0x11c3   :  { %v2573_v21 = vadd.f32 %v2572_v42, %v2571_v20 }
0x11c5   :  { %v2574_v24 = vmul.f32 0.5, %v2573_v21 }
0x11c7   :  { %v2575_v26 = vadd.f32 1e-05, %v2574_v24 }
0x11c9   :  { %4079 = vrsqrt.f32 %v2575_v26 }
0x11d3   :  { %v4080_v27 = vpop.eup %4079 }
0x11d4   :  { %v2577_v28 = vmul.f32 %v4080_v27, %v2565_v13  ;;  %v4024_v13 = vpack.c.bf16 %v2865_v12, %v2864_v11  ;;  %v3256_v12 = vld [vmem:[#allocation5 + $0x148] ss:$0 sm:$0xff] }
0x11d6   :  { %v2578_v29 = vmul.f32 %v4400_v6, %v2577_v28 }
0x11d8   :  { %v2579_v30 = vadd.f32 %v4402_v8, %v2578_v29  ;;  %v2678_v8 = vld [vmem:[#allocation5 + $0xf0] sm:$0xff] }
0x11d9   :  { %v4018_v14 = vpack.c.bf16 %v2679_v37, %v2678_v8  ;;  %v3253_v8 = vld [vmem:[#allocation5 + $0x118] ss:$0 sm:$0xff] }
0x11da   :  { %v2580_v31 = vmax.f32 %v2579_v30, 0.0 }
0x11dc   :  { %3777 = vmatmul.mubr.msk.f32.vlgmr.msra.gmra.mrb[26].mxu1 %vm161_vm3, %v2580_v31 }
0x11dd   :  { %3803 = vmatprep.mubr.msk.f32.mxu1 %vm4169_vm0, %v4170_v1  ;;  %4025 = vmatpush3.bf16.msra.mxu1 %v4024_v13 }
0x11de   :  { %4026 = vmatprep.subr.bf16.mxu1 %v4168_v0 }
0x11e1   :  { %4028 = vmatpush3.bf16.msra.mxu1 %v4027_v16 }
0x11e2   :  { %4035 = vmatprep.subr.bf16.mxu1 %v4168_v0 }
0x1216   :  { %v2479_v32 = vpop.permute.xlu0 %2478 }
0x1217   :  { %v2481_v34 = vmul.f32 %v4091_v33, %v2479_v32 }
0x1219   :  { %2483 = vrot.lane.b32.xlu1 %v2481_v34, %s4171_s1 }
0x1272   :  { %v2470_v23 = vpop.f32.mrb[24].mxu1 }
0x1273   :  { %v2471_v6 = vadd.f32 %v3247_v35, %v2470_v23  ;;  %v3756_v36 = vpop.f32.mrb[25].mxu1 }
0x1275   :  { %3172 = vst.msk [vmem:[#allocation7 + $0xe] sm:$0x3] %vm3161_vm7, %v2471_v6 }
0x128b   :  { %v2484_v38 = vpop.permute.xlu1 %2483 }
0x128c   :  { %v2486_v39 = vadd.f32 %v2484_v38, %v4458_v50  ;;  %v3254_v38 = vld [vmem:[#allocation5 + $0x120] ss:$0 sm:$0xff] }
0x128e   :  { %3159 = vst.msk [vmem:[#allocation7 + $0x2] sm:$0x3] %vm3158_vm9, %v2486_v39  ;;  %3782 = vmatmul.mubr.msk.f32.vlgmr.msra.gmra.mrb[28].mxu0 %vm2683_vm10, %v2486_v39 }
0x128f   :  { %4019 = vmatpush3.bf16.msra.mxu0 %v4018_v14  ;;  %3792 = vmatprep.mubr.msk.f32.mxu0 %vm4169_vm0, %v4170_v1 }
0x1290   :  { %4020 = vmatprep.subr.bf16.mxu0 %v4168_v0 }
0x1293   :  { %4022 = vmatpush3.bf16.msra.mxu0 %v4021_v44  ;;  %v2976_v44 = vld [vmem:[#allocation5 + $0x508] sm:$0xff] }
0x1294   :  { %4029 = vmatprep.subr.bf16.mxu0 %v4168_v0 }
0x12af   :  { %v2650_v45 = vpop.f32.mrb[26].mxu1 }
0x12b0   :  { %v2654_v46 = vsel %vm121_vm2, %v2650_v45, 0.0  ;;  %v3778_v19 = vpop.f32.mrb[27].mxu1 }
0x12b1   :  { %v2655_v47 = vrot.slane %v2654_v46, 4  ;;  %v2978_v19 = vld [vmem:[#allocation5 + $0x518] sm:$0xff] }
0x12b3   :  { %v2656_v48 = vadd.f32 %v2655_v47, %v2654_v46  ;;  %v2977_v46 = vld [vmem:[#allocation5 + $0x510] sm:$0xff] }
0x12b4   :  { %v4033_v47 = vpack.c.bf16 %v2978_v19, %v2977_v46 }
0x12b5   :  { %v2657_v25 = vrot.slane %v2656_v48, 2 }
0x12b7   :  { %v2658_v49 = vadd.f32 %v2657_v25, %v2656_v48  ;;  %v3058_v48 = vld [vmem:[#allocation5 + $0x528] sm:$0xff]  ;;  %v3059_v25 = vld [vmem:[#allocation5 + $0x530] sm:$0xff] }
0x12b9   :  { %v2659_v50 = vrot.slane %v2658_v49, 1 }
0x12bb   :  { %v2660_v58 = vadd.f32 %v2659_v50, %v2658_v49  ;;  %v4036_v49 = vpack.c.bf16 %v3059_v25, %v3058_v48 }
0x12bd   :  { %v2661_v51 = vmul.f32 0.5, %v2660_v58 }
0x12bf   :  { %v2662_v53 = vsub.f32 %v2650_v45, %v2661_v51  ;;  %v4030_v45 = vpack.c.bf16 %v2976_v44, %v2975_v22 }
0x12c1   :  { %v2663_v55 = vmul.f32 %v2662_v53, %v2662_v53 }
0x12c3   :  { %v2664_v56 = vsel %vm121_vm2, %v2663_v55, 0.0 }
0x12c4   :  { %v2665_v57 = vrot.slane %v2664_v56, 4 }
0x12c6   :  { %v2666_v59 = vadd.f32 %v2665_v57, %v2664_v56 }
0x12c8   :  { %v2667_v60 = vrot.slane %v2666_v59, 2 }
0x12ca   :  { %v2668_v61 = vadd.f32 %v2667_v60, %v2666_v59 }
0x12cc   :  { %v2669_v62 = vrot.slane %v2668_v61, 1 }
0x12ce   :  { %v2670_v63 = vadd.f32 %v2669_v62, %v2668_v61 }
0x12d0   :  { %v2671_v2 = vmul.f32 0.5, %v2670_v63 }
0x12d2   :  { %v2672_v3 = vadd.f32 1e-05, %v2671_v2 }
0x12d4   :  { %4081 = vrsqrt.f32 %v2672_v3 }
0x12de   :  { %v4082_v4 = vpop.eup %4081 }
0x12df   :  { %v2674_v40 = vmul.f32 %v4082_v4, %v2662_v53 }
0x12e1   :  { %v2675_v7 = vmul.f32 %v4419_v52, %v2674_v40 }
0x12e3   :  { %v2676_v9 = vadd.f32 %v4421_v54, %v2675_v7 }
0x12e5   :  { %v2677_v10 = vmax.f32 %v2676_v9, 0.0 }
0x12e7   :  { %3793 = vmatmul.mubr.msk.f32.vlgmr.msra.gmra.mrb[28].mxu0 %vm161_vm3, %v2677_v10 }
0x12e8   :  { %3814 = vmatprep.mubr.msk.f32.mxu0 %vm4169_vm0, %v4170_v1  ;;  %4031 = vmatpush3.bf16.msra.mxu0 %v4030_v45 }
0x12e9   :  { %4032 = vmatprep.subr.bf16.mxu0 %v4168_v0 }
0x12ec   :  { %4034 = vmatpush3.bf16.msra.mxu0 %v4033_v47 }
0x13ba   :  { %v2826_v52 = vpop.f32.mrb[28].mxu0 }
0x13bb   :  { %v2830_v54 = vsel %vm121_vm2, %v2826_v52, 0.0  ;;  %v3794_v17 = vpop.f32.mrb[29].mxu0 }
0x13bc   :  { %v2831_v18 = vrot.slane %v2830_v54, 4  ;;  %v3061_v17 = vld [vmem:[#allocation5 + $0x540] sm:$0xff] }
0x13be   :  { %v2832_v20 = vadd.f32 %v2831_v18, %v2830_v54  ;;  %v3060_v54 = vld [vmem:[#allocation5 + $0x538] sm:$0xff] }
0x13bf   :  { %v4039_v18 = vpack.c.bf16 %v3061_v17, %v3060_v54 }
0x13c0   :  { %v2833_v42 = vrot.slane %v2832_v20, 2 }
0x13c2   :  { %v2834_v21 = vadd.f32 %v2833_v42, %v2832_v20  ;;  %v3258_v20 = vld [vmem:[#allocation5 + $0x520] ss:$0 sm:$0xff] }
0x13c4   :  { %v2835_v24 = vrot.slane %v2834_v21, 1 }
0x13c6   :  { %v2836_v26 = vadd.f32 %v2835_v24, %v2834_v21 }
0x13c8   :  { %v2837_v27 = vmul.f32 0.5, %v2836_v26 }
0x13ca   :  { %v2838_v28 = vsub.f32 %v2826_v52, %v2837_v27  ;;  %v3260_v27 = vld [vmem:[#allocation5 + $0x548] ss:$0 sm:$0xff] }
0x13cc   :  { %v2839_v29 = vmul.f32 %v2838_v28, %v2838_v28 }
0x13ce   :  { %v2840_v30 = vsel %vm121_vm2, %v2839_v29, 0.0 }
0x13cf   :  { %v2841_v31 = vrot.slane %v2840_v30, 4 }
0x13d1   :  { %v2842_v5 = vadd.f32 %v2841_v31, %v2840_v30 }
0x13d3   :  { %v2843_v32 = vrot.slane %v2842_v5, 2 }
0x13d5   :  { %v2844_v33 = vadd.f32 %v2843_v32, %v2842_v5 }
0x13d7   :  { %v2845_v34 = vrot.slane %v2844_v33, 1 }
0x13d9   :  { %v2846_v35 = vadd.f32 %v2845_v34, %v2844_v33 }
0x13db   :  { %v2847_v23 = vmul.f32 0.5, %v2846_v35 }
0x13dd   :  { %v2848_v6 = vadd.f32 1e-05, %v2847_v23 }
0x13df   :  { %4083 = vrsqrt.f32 %v2848_v6 }
0x13e9   :  { %v4084_v36 = vpop.eup %4083 }
0x13ea   :  { %v2850_v37 = vmul.f32 %v4084_v36, %v2838_v28 }
0x13ec   :  { %v2856_v14 = vmul.f32 %v3253_v8, %v2850_v37 }
0x13ee   :  { %v2862_v39 = vadd.f32 %v3254_v38, %v2856_v14 }
0x13f0   :  { %v2863_v41 = vmax.f32 %v2862_v39, 0.0 }
0x13f2   :  { %3804 = vmatmul.mubr.msk.f32.vlgmr.msra.gmra.mrb[28].mxu1 %vm161_vm3, %v2863_v41 }
0x13f3   :  { %3825 = vmatprep.mubr.msk.f32.mxu1 %vm4169_vm0, %v4170_v1  ;;  %4037 = vmatpush3.bf16.msra.mxu1 %v4036_v49 }
0x13f4   :  { %4038 = vmatprep.subr.bf16.mxu1 %v4168_v0 }
0x13f7   :  { %4040 = vmatpush3.bf16.msra.mxu1 %v4039_v18 }
0x14c5   :  { %v2937_v50 = vpop.f32.mrb[28].mxu1 }
0x14c6   :  { %v2941_v58 = vsel %vm121_vm2, %v2937_v50, 0.0  ;;  %v3805_v1 = vpop.f32.mrb[29].mxu1 }
0x14c7   :  { %v2942_v51 = vrot.slane %v2941_v58, 4 }
0x14c9   :  { %v2943_v53 = vadd.f32 %v2942_v51, %v2941_v58 }
0x14cb   :  { %v2944_v55 = vrot.slane %v2943_v53, 2 }
0x14cd   :  { %v2945_v56 = vadd.f32 %v2944_v55, %v2943_v53 }
0x14cf   :  { %v2946_v57 = vrot.slane %v2945_v56, 1 }
0x14d1   :  { %v2947_v59 = vadd.f32 %v2946_v57, %v2945_v56 }
0x14d3   :  { %v2948_v60 = vmul.f32 0.5, %v2947_v59 }
0x14d5   :  { %v2949_v61 = vsub.f32 %v2937_v50, %v2948_v60 }
0x14d7   :  { %v2950_v62 = vmul.f32 %v2949_v61, %v2949_v61 }
0x14d9   :  { %v2951_v63 = vsel %vm121_vm2, %v2950_v62, 0.0 }
0x14da   :  { %v2952_v2 = vrot.slane %v2951_v63, 4 }
0x14dc   :  { %v2953_v3 = vadd.f32 %v2952_v2, %v2951_v63 }
0x14de   :  { %v2954_v4 = vrot.slane %v2953_v3, 2 }
0x14e0   :  { %v2955_v40 = vadd.f32 %v2954_v4, %v2953_v3 }
0x14e2   :  { %v2956_v0 = vrot.slane %v2955_v40, 1 }
0x14e4   :  { %v2957_v7 = vadd.f32 %v2956_v0, %v2955_v40 }
0x14e6   :  { %v2958_v9 = vmul.f32 0.5, %v2957_v7 }
0x14e8   :  { %v2959_v10 = vadd.f32 1e-05, %v2958_v9 }
0x14ea   :  { %4085 = vrsqrt.f32 %v2959_v10 }
0x14f4   :  { %v4086_v11 = vpop.eup %4085 }
0x14f5   :  { %v2961_v13 = vmul.f32 %v4086_v11, %v2949_v61 }
0x14f7   :  { %v2967_v43 = vmul.f32 %v3256_v12, %v2961_v13 }
0x14f9   :  { %v2973_v16 = vadd.f32 %v3257_v15, %v2967_v43 }
0x14fb   :  { %v2974_v52 = vmax.f32 %v2973_v16, 0.0 }
0x14fd   :  { %3815 = vmatmul.mubr.msk.f32.vlgmr.msra.gmra.mrb[30].mxu0 %vm161_vm3, %v2974_v52 }
0x15d0   :  { %v3053_v42 = vpop.f32.mrb[30].mxu0 }
0x15d1   :  { %v3054_v21 = vadd.f32 %v3258_v20, %v3053_v42  ;;  %v3816_v24 = vpop.f32.mrb[31].mxu0 }
0x15d3   :  { %v3057_v26 = vmax.f32 %v3054_v21, 0.0 }
0x15d5   :  { %3826 = vmatmul.mubr.msk.f32.vlgmr.msra.gmra.mrb[30].mxu1 %vm161_vm3, %v3057_v26 }
0x16a8   :  { %v3136_v28 = vpop.f32.mrb[30].mxu1 }
0x16a9   :  { %v3137_v29 = vadd.f32 %v3260_v27, %v3136_v28  ;;  %v3827_v30 = vpop.f32.mrb[31].mxu1 }
0x16ab   :  { %v3262_v31 = vmul.f32 -1.442695, %v3137_v29 }
0x16ad   :  { %4087 = vpow2.f32 %v3262_v31 }
0x16b7   :  { %v4088_v5 = vpop.eup %4087 }
0x16b8   :  { %v3143_v32 = vadd.f32 1.0, %v4088_v5 }
0x16ba   :  { %4089 = vrcp.f32 %v3143_v32 }
0x16c4   :  { %v4090_v33 = vpop.eup %4089 }
0x16c5   :  { %3156 = vst.msk [vmem:[#allocation7] sm:$0x3] %vm3155_vm6, %v4090_v33 }
0x16c6   :  { %4147 = shalt.err (!%p4144_p6)
}
0x16c7   :  { %s4148_s14 = scalar_lea.hbm %s4522_s2, 288 }
0x16c8   :  { %p4149_p7 = scmp.ne.s32.totalorder %s4522_s2, %s4148_s14  ;;  %p4152_p8 = scmp.lt.u32.totalorder %s4148_s14, %s4522_s2 }
0x16ca   :  { %p4154_p9 = pnand %p4152_p8, %p4149_p7 }
0x16cc   :  { %4157 = shalt.err (!%p4154_p9)
}
0x16cd   :  { %s4176_s19 = smov 32   ;;  %s4177_s20 = smov 2  }
0x16ce   :  { %3186 = dma.vmem_to_hbm [thread:$0]  %s3181_s10, 288, %s4522_s2, [#allocation4], %s4176_s19, %s4176_s19, %s4177_s20  }
0x16cf   :  { %4162 = dma.done.wait [#allocation4], 288  }
0x16d0   :  { %4163 = vsyncadd [#allocation4], 4294967008 }
0x16d1   :  { %3190 = vsyncpa [#allocation3], 1 }
0x16d2   :  { %3191 = vsyncpa [#allocation6], 1 }
0x16d3   :  { %3192 = vsyncpa [#allocation4], 1 }

</bundles_post_ra>
